<compile_context>
chip_gen: v7x
topology: tpu7x:2x2x1
jax: 0.10.0
libtpu: 0.0.40
codegen_flags: <defaults>
</compile_context>

<pallas_src>
import functools

import jax
import jax.numpy as jnp
import numpy as np
from jax import lax
from jax.experimental import pallas as pl
from jax.experimental.pallas import tpu as pltpu


# Channel-count threshold below which the per-tap contraction runs on the VPU
# (broadcast MACs) instead of the MXU.
_MXU_MIN_CHANNELS = 8


def _boundary_masks(c, H, W):
    """Row/col boundary masks over the flattened (c, H*W) spatial layout."""
    HW = H * W
    lane = lax.broadcasted_iota(jnp.int32, (c, HW), 1)
    row_first = lane < W
    row_last = lane >= HW - W
    if (W & (W - 1)) == 0:                 # power-of-two fast path (bitwise and)
        col = lane & (W - 1)
    else:
        col = lane % W
    return row_first, row_last, col == 0, col == (W - 1)


def _conv3x3_relu(t, w_ref, b_ref, c_in, H, W):
    """relu(conv3x3(t) + b) with reflect padding, channels-major.

    t     : (c_in, H*W)      f32, spatial flattened on the lane axis
    w_ref : (c_out, 9*c_in)  weights, tap-major contraction axis ((dy*3+dx)*c_in + ci)
    b_ref : (c_out, 1)
    returns (c_out, H*W) f32
    """
    HW = H * W
    c_out = w_ref.shape[0]
    row_first, row_last, col_first, col_last = _boundary_masks(c_in, H, W)

    # 3 row-shifted copies (reflect at top/bottom rows), each reused by 3 taps.
    # pltpu.roll runs on the XLU; the boundary-fix select on the VPU.
    rows = []
    for oy in (-1, 0, 1):
        if oy == 0:
            rows.append(t)
        else:
            main = pltpu.roll(t, (-oy * W) % HW, axis=1)   # t[y+oy, x] (interior rows)
            refl = pltpu.roll(t, (oy * W) % HW, axis=1)    # reflected boundary row
            rows.append(jnp.where(row_last if oy > 0 else row_first, refl, main))

    acc = jnp.zeros((c_out, HW), jnp.float32)
    tap = 0
    for r in rows:                                         # oy = -1, 0, +1
        for ox in (-1, 0, 1):
            if ox == 0:
                s = r
            else:
                main = pltpu.roll(r, (-ox) % HW, axis=1)   # r[y, x+ox] (interior cols)
                refl = pltpu.roll(r, ox % HW, axis=1)      # reflected boundary col
                s = jnp.where(col_last if ox > 0 else col_first, refl, main)
            base = tap * c_in
            if min(c_in, c_out) < _MXU_MIN_CHANNELS:
                # Tiny channels: 9*c_in lane-dense broadcast MACs on the VPU.
                for ci in range(c_in):
                    w_col = w_ref[:, base + ci:base + ci + 1].astype(jnp.float32)  # (c_out, 1)
                    acc = acc + w_col * s[ci:ci + 1, :]
            else:
                # TODO(synk): cast w_tap / s to bf16 on v6e/v7x (keep f32 accumulate)
                # once channel counts make this MXU-bound; loosen tolerances then.
                w_tap = w_ref[:, base:base + c_in].astype(jnp.float32)             # (c_out, c_in)
                acc = acc + lax.dot_general(
                    w_tap, s,
                    dimension_numbers=(((1,), (0,)), ((), ())),
                    preferred_element_type=jnp.float32,
                    precision=lax.Precision.HIGHEST)
            tap += 1
    return jnp.maximum(acc + b_ref[...].astype(jnp.float32), 0.0)


def _double_conv_kernel(x_ref, w1_ref, b1_ref, w2_ref, b2_ref, o_ref, *, H, W):
    """Fused DoubleConv for one image per grid step (channels-major throughout).

    x_ref : (1, Cin, H*W)    input tile (H*W on lanes)
    w1_ref: (Cmid, 9*Cin)    conv1 weight (tap-major contraction axis)
    b1_ref: (Cmid, 1)
    w2_ref: (Cout, 9*Cmid)   conv2 weight
    b2_ref: (Cout, 1)
    o_ref : (1, Cout, H*W)   output tile (lane-dense, channels-major)
    """
    c_in = x_ref.shape[1]
    c_mid = w1_ref.shape[0]

    x = x_ref[0].astype(jnp.float32)                       # (Cin, H*W)
    h = _conv3x3_relu(x, w1_ref, b1_ref, c_in, H, W)       # (Cmid, H*W), stays on-chip
    y = _conv3x3_relu(h, w2_ref, b2_ref, c_mid, H, W)      # (Cout, H*W)
    o_ref[0] = y.astype(o_ref.dtype)


def double_conv_fused(x_nchw, w1, b1, w2, b2):
    """x_nchw: (N, Cin, H, W); w*: (3, 3, Cin, Cout) HWIO; b*: (Cout,).

    Returns relu(conv2(relu(conv1(x)))), both convs 3x3 with reflect padding 1, in NCHW.
    """
    N, Cin, H, W = x_nchw.shape
    assert H >= 2 and W >= 2, "reflect padding (pad=1) requires H >= 2 and W >= 2"
    Cmid = w1.shape[-1]
    Cout = w2.shape[-1]
    HW = H * W

    # NCHW is already channels-major: flattening spatial dims is free and keeps
    # H*W (a multiple of 128 here) on the lane axis end to end (no transpose).
    x_flat = x_nchw.reshape(N, Cin, HW)

    # Row-major reshape of (3, 3, Cin, Cout) puts tap index (dy*3+dx)*Cin + ci on
    # the contraction axis (matches the in-kernel tap order); transpose so the
    # kernel emits (C_out, H*W) directly -> lane-dense output, no transpose back.
    w1_k = w1.reshape(9 * Cin, Cmid).T                     # (Cmid, 9*Cin)
    w2_k = w2.reshape(9 * Cmid, Cout).T                    # (Cout, 9*Cmid)
    b1_k = b1.reshape(Cmid, 1)
    b2_k = b2.reshape(Cout, 1)

    # TODO(synk): for large H/W add a row-tile grid axis with a 2-row halo
    # (tile_rows*W a multiple of 128) so per-step VMEM stays under v7x's 64 MiB and
    # both v7x TensorCores get work at batch 1; also set vmem_limit_bytes (v5e's
    # default scoped VMEM is 16 MiB) once tiles grow. Whole-image blocks are fine here.
    out_flat = pl.pallas_call(
        functools.partial(_double_conv_kernel, H=H, W=W),
        out_shape=jax.ShapeDtypeStruct((N, Cout, HW), x_nchw.dtype),
        grid_spec=pltpu.PrefetchScalarGridSpec(
            num_scalar_prefetch=0,
            grid=(N,),
            in_specs=[
                pl.BlockSpec((1, Cin, HW), lambda n: (n, 0, 0)),
                pl.BlockSpec((Cmid, 9 * Cin), lambda n: (0, 0)),
                pl.BlockSpec((Cmid, 1), lambda n: (0, 0)),
                pl.BlockSpec((Cout, 9 * Cmid), lambda n: (0, 0)),
                pl.BlockSpec((Cout, 1), lambda n: (0, 0)),
            ],
            out_specs=pl.BlockSpec((1, Cout, HW), lambda n: (n, 0, 0)),
        ),
        compiler_params=pltpu.CompilerParams(
            dimension_semantics=("parallel",),
        ),
    )(x_flat, w1_k, b1_k, w2_k, b2_k)

    return out_flat.reshape(N, Cout, H, W)


class DoubleConvPallas:
    """DoubleConv(in_features) with default flags (res=False, hin=False, bn=False)."""

    def __init__(self, in_features, out_channels=None, mid_channels=None, *, key):
        if not out_channels:
            out_channels = in_features
        if not mid_channels:
            mid_channels = out_channels
        k1, k2, k3, k4 = jax.random.split(key, 4)
        lim1 = 1.0 / np.sqrt(in_features * 9)
        lim2 = 1.0 / np.sqrt(mid_channels * 9)
        # weights stored as (kh, kw, Cin, Cout)
        self.w1 = jax.random.uniform(k1, (3, 3, in_features, mid_channels),
                                     jnp.float32, -lim1, lim1)
        self.b1 = jax.random.uniform(k2, (mid_channels,), jnp.float32, -lim1, lim1)
        self.w2 = jax.random.uniform(k3, (3, 3, mid_channels, out_channels),
                                     jnp.float32, -lim2, lim2)
        self.b2 = jax.random.uniform(k4, (out_channels,), jnp.float32, -lim2, lim2)

    def __call__(self, x_nchw):
        return double_conv_fused(x_nchw, self.w1, self.b1, self.w2, self.b2)


def _reference(x_nchw, mod):
    """Pure-JAX reference (reflect pad + lax.conv) for correctness check."""
    def conv(x, w, b):
        xp = jnp.pad(x, ((0, 0), (0, 0), (1, 1), (1, 1)), mode="reflect")
        w_oihw = jnp.transpose(w, (3, 2, 0, 1))
        y = lax.conv_general_dilated(
            xp, w_oihw, window_strides=(1, 1), padding="VALID",
            dimension_numbers=("NCHW", "OIHW", "NCHW"),
            precision=lax.Precision.HIGHEST)
        return jnp.maximum(y + b[None, :, None, None], 0.0)

    h = conv(x_nchw, mod.w1, mod.b1)
    return conv(h, mod.w2, mod.b2)


if __name__ == "__main__":
    key = jax.random.PRNGKey(0)
    kx, kp = jax.random.split(key)

    N, C, H, W = 2, 4, 16, 16
    x = jax.random.normal(kx, (N, C, H, W), jnp.float32)

    mod = DoubleConvPallas(in_features=C, key=kp)

    out = jax.block_until_ready(mod(x))
    ref = jax.block_until_ready(_reference(x, mod))
    np.testing.assert_allclose(np.asarray(out), np.asarray(ref), rtol=1e-4, atol=1e-4)

    assert out.shape == (N, C, H, W)
    print("KERNEL_OK")
</pallas_src>

<mosaic_0001>
module attributes {stable_mosaic.version = 11 : i64} {
  func.func @_double_conv_kernel(%arg0: i32, %arg1: memref<1x4x256xf32, #tpu.memory_space<vmem>>, %arg2: memref<4x36xf32, #tpu.memory_space<vmem>>, %arg3: memref<4x1xf32, #tpu.memory_space<vmem>>, %arg4: memref<4x36xf32, #tpu.memory_space<vmem>>, %arg5: memref<4x1xf32, #tpu.memory_space<vmem>>, %arg6: memref<1x4x256xf32, #tpu.memory_space<vmem>>) attributes {dimension_semantics = [#tpu.dimension_semantics<parallel>], iteration_bounds = array<i64: 2>, scalar_prefetch = 0 : i64, scratch_operands = 0 : i64, tpu.core_type = #tpu.core_type<tc>, window_params = [{transform_indices = @transform_0, window_bounds = array<i64: 1, 4, 256>}, {pipeline_mode = #tpu.pipeline_mode<synchronous>, transform_indices = @transform_1, window_bounds = array<i64: 4, 36>}, {pipeline_mode = #tpu.pipeline_mode<synchronous>, transform_indices = @transform_2, window_bounds = array<i64: 4, 1>}, {pipeline_mode = #tpu.pipeline_mode<synchronous>, transform_indices = @transform_3, window_bounds = array<i64: 4, 36>}, {pipeline_mode = #tpu.pipeline_mode<synchronous>, transform_indices = @transform_4, window_bounds = array<i64: 4, 1>}, {transform_indices = @transform_5, window_bounds = array<i64: 1, 4, 256>}]} {
    %c0 = arith.constant 0 : index
    %c0_0 = arith.constant 0 : index
    %c0_1 = arith.constant 0 : index
    %0 = vector.load %arg1[%c0, %c0_0, %c0_1] : memref<1x4x256xf32, #tpu.memory_space<vmem>>, vector<1x4x256xf32>
    %1 = vector.shape_cast %0 : vector<1x4x256xf32> to vector<4x256xf32>
    %2 = tpu.iota {dimensions = array<i32: 1>} : vector<4x256xi32>
    %c16_i32 = arith.constant 16 : i32
    %3 = vector.broadcast %c16_i32 : i32 to vector<4x256xi32>
    %4 = arith.cmpi slt, %2, %3 : vector<4x256xi32>
    %c240_i32 = arith.constant 240 : i32
    %5 = vector.broadcast %c240_i32 : i32 to vector<4x256xi32>
    %6 = arith.cmpi sge, %2, %5 : vector<4x256xi32>
    %c15_i32 = arith.constant 15 : i32
    %7 = vector.broadcast %c15_i32 : i32 to vector<4x256xi32>
    %8 = arith.andi %2, %7 : vector<4x256xi32>
    %c0_i32 = arith.constant 0 : i32
    %9 = vector.broadcast %c0_i32 : i32 to vector<4x256xi32>
    %10 = arith.cmpi eq, %8, %9 : vector<4x256xi32>
    %c15_i32_2 = arith.constant 15 : i32
    %11 = vector.broadcast %c15_i32_2 : i32 to vector<4x256xi32>
    %12 = arith.cmpi eq, %8, %11 : vector<4x256xi32>
    %c16_i32_3 = arith.constant 16 : i32
    %13 = tpu.dynamic_rotate %1 by %c16_i32_3 dim 1 : vector<4x256xf32>, i32 -> vector<4x256xf32>
    %c240_i32_4 = arith.constant 240 : i32
    %14 = tpu.dynamic_rotate %1 by %c240_i32_4 dim 1 : vector<4x256xf32>, i32 -> vector<4x256xf32>
    %15 = arith.select %4, %14, %13 : vector<4x256xi1>, vector<4x256xf32>
    %c240_i32_5 = arith.constant 240 : i32
    %16 = tpu.dynamic_rotate %1 by %c240_i32_5 dim 1 : vector<4x256xf32>, i32 -> vector<4x256xf32>
    %c16_i32_6 = arith.constant 16 : i32
    %17 = tpu.dynamic_rotate %1 by %c16_i32_6 dim 1 : vector<4x256xf32>, i32 -> vector<4x256xf32>
    %18 = arith.select %6, %17, %16 : vector<4x256xi1>, vector<4x256xf32>
    %cst = arith.constant 0.000000e+00 : f32
    %19 = vector.broadcast %cst : f32 to vector<4x256xf32>
    %c1_i32 = arith.constant 1 : i32
    %20 = tpu.dynamic_rotate %15 by %c1_i32 dim 1 : vector<4x256xf32>, i32 -> vector<4x256xf32>
    %c255_i32 = arith.constant 255 : i32
    %21 = tpu.dynamic_rotate %15 by %c255_i32 dim 1 : vector<4x256xf32>, i32 -> vector<4x256xf32>
    %22 = arith.select %10, %21, %20 : vector<4x256xi1>, vector<4x256xf32>
    %c0_7 = arith.constant 0 : index
    %c0_8 = arith.constant 0 : index
    %23 = vector.load %arg2[%c0_7, %c0_8] : memref<4x36xf32, #tpu.memory_space<vmem>>, vector<4x1xf32>
    %24 = vector.extract_strided_slice %22 {offsets = [0, 0], sizes = [1, 256], strides = [1, 1]} : vector<4x256xf32> to vector<1x256xf32>
    %25 = vector.broadcast %23 : vector<4x1xf32> to vector<4x256xf32>
    %26 = vector.broadcast %24 : vector<1x256xf32> to vector<4x256xf32>
    %27 = arith.mulf %25, %26 : vector<4x256xf32>
    %28 = arith.addf %19, %27 : vector<4x256xf32>
    %c0_9 = arith.constant 0 : index
    %c1 = arith.constant 1 : index
    %29 = vector.load %arg2[%c0_9, %c1] : memref<4x36xf32, #tpu.memory_space<vmem>>, vector<4x1xf32>
    %30 = vector.extract_strided_slice %22 {offsets = [1, 0], sizes = [1, 256], strides = [1, 1]} : vector<4x256xf32> to vector<1x256xf32>
    %31 = vector.broadcast %29 : vector<4x1xf32> to vector<4x256xf32>
    %32 = vector.broadcast %30 : vector<1x256xf32> to vector<4x256xf32>
    %33 = arith.mulf %31, %32 : vector<4x256xf32>
    %34 = arith.addf %28, %33 : vector<4x256xf32>
    %c0_10 = arith.constant 0 : index
    %c2 = arith.constant 2 : index
    %35 = vector.load %arg2[%c0_10, %c2] : memref<4x36xf32, #tpu.memory_space<vmem>>, vector<4x1xf32>
    %36 = vector.extract_strided_slice %22 {offsets = [2, 0], sizes = [1, 256], strides = [1, 1]} : vector<4x256xf32> to vector<1x256xf32>
    %37 = vector.broadcast %35 : vector<4x1xf32> to vector<4x256xf32>
    %38 = vector.broadcast %36 : vector<1x256xf32> to vector<4x256xf32>
    %39 = arith.mulf %37, %38 : vector<4x256xf32>
    %40 = arith.addf %34, %39 : vector<4x256xf32>
    %c0_11 = arith.constant 0 : index
    %c3 = arith.constant 3 : index
    %41 = vector.load %arg2[%c0_11, %c3] : memref<4x36xf32, #tpu.memory_space<vmem>>, vector<4x1xf32>
    %42 = vector.extract_strided_slice %22 {offsets = [3, 0], sizes = [1, 256], strides = [1, 1]} : vector<4x256xf32> to vector<1x256xf32>
    %43 = vector.broadcast %41 : vector<4x1xf32> to vector<4x256xf32>
    %44 = vector.broadcast %42 : vector<1x256xf32> to vector<4x256xf32>
    %45 = arith.mulf %43, %44 : vector<4x256xf32>
    %46 = arith.addf %40, %45 : vector<4x256xf32>
    %c0_12 = arith.constant 0 : index
    %c4 = arith.constant 4 : index
    %47 = vector.load %arg2[%c0_12, %c4] : memref<4x36xf32, #tpu.memory_space<vmem>>, vector<4x1xf32>
    %48 = vector.extract_strided_slice %15 {offsets = [0, 0], sizes = [1, 256], strides = [1, 1]} : vector<4x256xf32> to vector<1x256xf32>
    %49 = vector.broadcast %47 : vector<4x1xf32> to vector<4x256xf32>
    %50 = vector.broadcast %48 : vector<1x256xf32> to vector<4x256xf32>
    %51 = arith.mulf %49, %50 : vector<4x256xf32>
    %52 = arith.addf %46, %51 : vector<4x256xf32>
    %c0_13 = arith.constant 0 : index
    %c5 = arith.constant 5 : index
    %53 = vector.load %arg2[%c0_13, %c5] : memref<4x36xf32, #tpu.memory_space<vmem>>, vector<4x1xf32>
    %54 = vector.extract_strided_slice %15 {offsets = [1, 0], sizes = [1, 256], strides = [1, 1]} : vector<4x256xf32> to vector<1x256xf32>
    %55 = vector.broadcast %53 : vector<4x1xf32> to vector<4x256xf32>
    %56 = vector.broadcast %54 : vector<1x256xf32> to vector<4x256xf32>
    %57 = arith.mulf %55, %56 : vector<4x256xf32>
    %58 = arith.addf %52, %57 : vector<4x256xf32>
    %c0_14 = arith.constant 0 : index
    %c6 = arith.constant 6 : index
    %59 = vector.load %arg2[%c0_14, %c6] : memref<4x36xf32, #tpu.memory_space<vmem>>, vector<4x1xf32>
    %60 = vector.extract_strided_slice %15 {offsets = [2, 0], sizes = [1, 256], strides = [1, 1]} : vector<4x256xf32> to vector<1x256xf32>
    %61 = vector.broadcast %59 : vector<4x1xf32> to vector<4x256xf32>
    %62 = vector.broadcast %60 : vector<1x256xf32> to vector<4x256xf32>
    %63 = arith.mulf %61, %62 : vector<4x256xf32>
    %64 = arith.addf %58, %63 : vector<4x256xf32>
    %c0_15 = arith.constant 0 : index
    %c7 = arith.constant 7 : index
    %65 = vector.load %arg2[%c0_15, %c7] : memref<4x36xf32, #tpu.memory_space<vmem>>, vector<4x1xf32>
    %66 = vector.extract_strided_slice %15 {offsets = [3, 0], sizes = [1, 256], strides = [1, 1]} : vector<4x256xf32> to vector<1x256xf32>
    %67 = vector.broadcast %65 : vector<4x1xf32> to vector<4x256xf32>
    %68 = vector.broadcast %66 : vector<1x256xf32> to vector<4x256xf32>
    %69 = arith.mulf %67, %68 : vector<4x256xf32>
    %70 = arith.addf %64, %69 : vector<4x256xf32>
    %c255_i32_16 = arith.constant 255 : i32
    %71 = tpu.dynamic_rotate %15 by %c255_i32_16 dim 1 : vector<4x256xf32>, i32 -> vector<4x256xf32>
    %c1_i32_17 = arith.constant 1 : i32
    %72 = tpu.dynamic_rotate %15 by %c1_i32_17 dim 1 : vector<4x256xf32>, i32 -> vector<4x256xf32>
    %73 = arith.select %12, %72, %71 : vector<4x256xi1>, vector<4x256xf32>
    %c0_18 = arith.constant 0 : index
    %c8 = arith.constant 8 : index
    %74 = vector.load %arg2[%c0_18, %c8] : memref<4x36xf32, #tpu.memory_space<vmem>>, vector<4x1xf32>
    %75 = vector.extract_strided_slice %73 {offsets = [0, 0], sizes = [1, 256], strides = [1, 1]} : vector<4x256xf32> to vector<1x256xf32>
    %76 = vector.broadcast %74 : vector<4x1xf32> to vector<4x256xf32>
    %77 = vector.broadcast %75 : vector<1x256xf32> to vector<4x256xf32>
    %78 = arith.mulf %76, %77 : vector<4x256xf32>
    %79 = arith.addf %70, %78 : vector<4x256xf32>
    %c0_19 = arith.constant 0 : index
    %c9 = arith.constant 9 : index
    %80 = vector.load %arg2[%c0_19, %c9] : memref<4x36xf32, #tpu.memory_space<vmem>>, vector<4x1xf32>
    %81 = vector.extract_strided_slice %73 {offsets = [1, 0], sizes = [1, 256], strides = [1, 1]} : vector<4x256xf32> to vector<1x256xf32>
    %82 = vector.broadcast %80 : vector<4x1xf32> to vector<4x256xf32>
    %83 = vector.broadcast %81 : vector<1x256xf32> to vector<4x256xf32>
    %84 = arith.mulf %82, %83 : vector<4x256xf32>
    %85 = arith.addf %79, %84 : vector<4x256xf32>
    %c0_20 = arith.constant 0 : index
    %c10 = arith.constant 10 : index
    %86 = vector.load %arg2[%c0_20, %c10] : memref<4x36xf32, #tpu.memory_space<vmem>>, vector<4x1xf32>
    %87 = vector.extract_strided_slice %73 {offsets = [2, 0], sizes = [1, 256], strides = [1, 1]} : vector<4x256xf32> to vector<1x256xf32>
    %88 = vector.broadcast %86 : vector<4x1xf32> to vector<4x256xf32>
    %89 = vector.broadcast %87 : vector<1x256xf32> to vector<4x256xf32>
    %90 = arith.mulf %88, %89 : vector<4x256xf32>
    %91 = arith.addf %85, %90 : vector<4x256xf32>
    %c0_21 = arith.constant 0 : index
    %c11 = arith.constant 11 : index
    %92 = vector.load %arg2[%c0_21, %c11] : memref<4x36xf32, #tpu.memory_space<vmem>>, vector<4x1xf32>
    %93 = vector.extract_strided_slice %73 {offsets = [3, 0], sizes = [1, 256], strides = [1, 1]} : vector<4x256xf32> to vector<1x256xf32>
    %94 = vector.broadcast %92 : vector<4x1xf32> to vector<4x256xf32>
    %95 = vector.broadcast %93 : vector<1x256xf32> to vector<4x256xf32>
    %96 = arith.mulf %94, %95 : vector<4x256xf32>
    %97 = arith.addf %91, %96 : vector<4x256xf32>
    %c1_i32_22 = arith.constant 1 : i32
    %98 = tpu.dynamic_rotate %1 by %c1_i32_22 dim 1 : vector<4x256xf32>, i32 -> vector<4x256xf32>
    %c255_i32_23 = arith.constant 255 : i32
    %99 = tpu.dynamic_rotate %1 by %c255_i32_23 dim 1 : vector<4x256xf32>, i32 -> vector<4x256xf32>
    %100 = arith.select %10, %99, %98 : vector<4x256xi1>, vector<4x256xf32>
    %c0_24 = arith.constant 0 : index
    %c12 = arith.constant 12 : index
    %101 = vector.load %arg2[%c0_24, %c12] : memref<4x36xf32, #tpu.memory_space<vmem>>, vector<4x1xf32>
    %102 = vector.extract_strided_slice %100 {offsets = [0, 0], sizes = [1, 256], strides = [1, 1]} : vector<4x256xf32> to vector<1x256xf32>
    %103 = vector.broadcast %101 : vector<4x1xf32> to vector<4x256xf32>
    %104 = vector.broadcast %102 : vector<1x256xf32> to vector<4x256xf32>
    %105 = arith.mulf %103, %104 : vector<4x256xf32>
    %106 = arith.addf %97, %105 : vector<4x256xf32>
    %c0_25 = arith.constant 0 : index
    %c13 = arith.constant 13 : index
    %107 = vector.load %arg2[%c0_25, %c13] : memref<4x36xf32, #tpu.memory_space<vmem>>, vector<4x1xf32>
    %108 = vector.extract_strided_slice %100 {offsets = [1, 0], sizes = [1, 256], strides = [1, 1]} : vector<4x256xf32> to vector<1x256xf32>
    %109 = vector.broadcast %107 : vector<4x1xf32> to vector<4x256xf32>
    %110 = vector.broadcast %108 : vector<1x256xf32> to vector<4x256xf32>
    %111 = arith.mulf %109, %110 : vector<4x256xf32>
    %112 = arith.addf %106, %111 : vector<4x256xf32>
    %c0_26 = arith.constant 0 : index
    %c14 = arith.constant 14 : index
    %113 = vector.load %arg2[%c0_26, %c14] : memref<4x36xf32, #tpu.memory_space<vmem>>, vector<4x1xf32>
    %114 = vector.extract_strided_slice %100 {offsets = [2, 0], sizes = [1, 256], strides = [1, 1]} : vector<4x256xf32> to vector<1x256xf32>
    %115 = vector.broadcast %113 : vector<4x1xf32> to vector<4x256xf32>
    %116 = vector.broadcast %114 : vector<1x256xf32> to vector<4x256xf32>
    %117 = arith.mulf %115, %116 : vector<4x256xf32>
    %118 = arith.addf %112, %117 : vector<4x256xf32>
    %c0_27 = arith.constant 0 : index
    %c15 = arith.constant 15 : index
    %119 = vector.load %arg2[%c0_27, %c15] : memref<4x36xf32, #tpu.memory_space<vmem>>, vector<4x1xf32>
    %120 = vector.extract_strided_slice %100 {offsets = [3, 0], sizes = [1, 256], strides = [1, 1]} : vector<4x256xf32> to vector<1x256xf32>
    %121 = vector.broadcast %119 : vector<4x1xf32> to vector<4x256xf32>
    %122 = vector.broadcast %120 : vector<1x256xf32> to vector<4x256xf32>
    %123 = arith.mulf %121, %122 : vector<4x256xf32>
    %124 = arith.addf %118, %123 : vector<4x256xf32>
    %c0_28 = arith.constant 0 : index
    %c16 = arith.constant 16 : index
    %125 = vector.load %arg2[%c0_28, %c16] : memref<4x36xf32, #tpu.memory_space<vmem>>, vector<4x1xf32>
    %126 = vector.extract_strided_slice %1 {offsets = [0, 0], sizes = [1, 256], strides = [1, 1]} : vector<4x256xf32> to vector<1x256xf32>
    %127 = vector.broadcast %125 : vector<4x1xf32> to vector<4x256xf32>
    %128 = vector.broadcast %126 : vector<1x256xf32> to vector<4x256xf32>
    %129 = arith.mulf %127, %128 : vector<4x256xf32>
    %130 = arith.addf %124, %129 : vector<4x256xf32>
    %c0_29 = arith.constant 0 : index
    %c17 = arith.constant 17 : index
    %131 = vector.load %arg2[%c0_29, %c17] : memref<4x36xf32, #tpu.memory_space<vmem>>, vector<4x1xf32>
    %132 = vector.extract_strided_slice %1 {offsets = [1, 0], sizes = [1, 256], strides = [1, 1]} : vector<4x256xf32> to vector<1x256xf32>
    %133 = vector.broadcast %131 : vector<4x1xf32> to vector<4x256xf32>
    %134 = vector.broadcast %132 : vector<1x256xf32> to vector<4x256xf32>
    %135 = arith.mulf %133, %134 : vector<4x256xf32>
    %136 = arith.addf %130, %135 : vector<4x256xf32>
    %c0_30 = arith.constant 0 : index
    %c18 = arith.constant 18 : index
    %137 = vector.load %arg2[%c0_30, %c18] : memref<4x36xf32, #tpu.memory_space<vmem>>, vector<4x1xf32>
    %138 = vector.extract_strided_slice %1 {offsets = [2, 0], sizes = [1, 256], strides = [1, 1]} : vector<4x256xf32> to vector<1x256xf32>
    %139 = vector.broadcast %137 : vector<4x1xf32> to vector<4x256xf32>
    %140 = vector.broadcast %138 : vector<1x256xf32> to vector<4x256xf32>
    %141 = arith.mulf %139, %140 : vector<4x256xf32>
    %142 = arith.addf %136, %141 : vector<4x256xf32>
    %c0_31 = arith.constant 0 : index
    %c19 = arith.constant 19 : index
    %143 = vector.load %arg2[%c0_31, %c19] : memref<4x36xf32, #tpu.memory_space<vmem>>, vector<4x1xf32>
    %144 = vector.extract_strided_slice %1 {offsets = [3, 0], sizes = [1, 256], strides = [1, 1]} : vector<4x256xf32> to vector<1x256xf32>
    %145 = vector.broadcast %143 : vector<4x1xf32> to vector<4x256xf32>
    %146 = vector.broadcast %144 : vector<1x256xf32> to vector<4x256xf32>
    %147 = arith.mulf %145, %146 : vector<4x256xf32>
    %148 = arith.addf %142, %147 : vector<4x256xf32>
    %c255_i32_32 = arith.constant 255 : i32
    %149 = tpu.dynamic_rotate %1 by %c255_i32_32 dim 1 : vector<4x256xf32>, i32 -> vector<4x256xf32>
    %c1_i32_33 = arith.constant 1 : i32
    %150 = tpu.dynamic_rotate %1 by %c1_i32_33 dim 1 : vector<4x256xf32>, i32 -> vector<4x256xf32>
    %151 = arith.select %12, %150, %149 : vector<4x256xi1>, vector<4x256xf32>
    %c0_34 = arith.constant 0 : index
    %c20 = arith.constant 20 : index
    %152 = vector.load %arg2[%c0_34, %c20] : memref<4x36xf32, #tpu.memory_space<vmem>>, vector<4x1xf32>
    %153 = vector.extract_strided_slice %151 {offsets = [0, 0], sizes = [1, 256], strides = [1, 1]} : vector<4x256xf32> to vector<1x256xf32>
    %154 = vector.broadcast %152 : vector<4x1xf32> to vector<4x256xf32>
    %155 = vector.broadcast %153 : vector<1x256xf32> to vector<4x256xf32>
    %156 = arith.mulf %154, %155 : vector<4x256xf32>
    %157 = arith.addf %148, %156 : vector<4x256xf32>
    %c0_35 = arith.constant 0 : index
    %c21 = arith.constant 21 : index
    %158 = vector.load %arg2[%c0_35, %c21] : memref<4x36xf32, #tpu.memory_space<vmem>>, vector<4x1xf32>
    %159 = vector.extract_strided_slice %151 {offsets = [1, 0], sizes = [1, 256], strides = [1, 1]} : vector<4x256xf32> to vector<1x256xf32>
    %160 = vector.broadcast %158 : vector<4x1xf32> to vector<4x256xf32>
    %161 = vector.broadcast %159 : vector<1x256xf32> to vector<4x256xf32>
    %162 = arith.mulf %160, %161 : vector<4x256xf32>
    %163 = arith.addf %157, %162 : vector<4x256xf32>
    %c0_36 = arith.constant 0 : index
    %c22 = arith.constant 22 : index
    %164 = vector.load %arg2[%c0_36, %c22] : memref<4x36xf32, #tpu.memory_space<vmem>>, vector<4x1xf32>
    %165 = vector.extract_strided_slice %151 {offsets = [2, 0], sizes = [1, 256], strides = [1, 1]} : vector<4x256xf32> to vector<1x256xf32>
    %166 = vector.broadcast %164 : vector<4x1xf32> to vector<4x256xf32>
    %167 = vector.broadcast %165 : vector<1x256xf32> to vector<4x256xf32>
    %168 = arith.mulf %166, %167 : vector<4x256xf32>
    %169 = arith.addf %163, %168 : vector<4x256xf32>
    %c0_37 = arith.constant 0 : index
    %c23 = arith.constant 23 : index
    %170 = vector.load %arg2[%c0_37, %c23] : memref<4x36xf32, #tpu.memory_space<vmem>>, vector<4x1xf32>
    %171 = vector.extract_strided_slice %151 {offsets = [3, 0], sizes = [1, 256], strides = [1, 1]} : vector<4x256xf32> to vector<1x256xf32>
    %172 = vector.broadcast %170 : vector<4x1xf32> to vector<4x256xf32>
    %173 = vector.broadcast %171 : vector<1x256xf32> to vector<4x256xf32>
    %174 = arith.mulf %172, %173 : vector<4x256xf32>
    %175 = arith.addf %169, %174 : vector<4x256xf32>
    %c1_i32_38 = arith.constant 1 : i32
    %176 = tpu.dynamic_rotate %18 by %c1_i32_38 dim 1 : vector<4x256xf32>, i32 -> vector<4x256xf32>
    %c255_i32_39 = arith.constant 255 : i32
    %177 = tpu.dynamic_rotate %18 by %c255_i32_39 dim 1 : vector<4x256xf32>, i32 -> vector<4x256xf32>
    %178 = arith.select %10, %177, %176 : vector<4x256xi1>, vector<4x256xf32>
    %c0_40 = arith.constant 0 : index
    %c24 = arith.constant 24 : index
    %179 = vector.load %arg2[%c0_40, %c24] : memref<4x36xf32, #tpu.memory_space<vmem>>, vector<4x1xf32>
    %180 = vector.extract_strided_slice %178 {offsets = [0, 0], sizes = [1, 256], strides = [1, 1]} : vector<4x256xf32> to vector<1x256xf32>
    %181 = vector.broadcast %179 : vector<4x1xf32> to vector<4x256xf32>
    %182 = vector.broadcast %180 : vector<1x256xf32> to vector<4x256xf32>
    %183 = arith.mulf %181, %182 : vector<4x256xf32>
    %184 = arith.addf %175, %183 : vector<4x256xf32>
    %c0_41 = arith.constant 0 : index
    %c25 = arith.constant 25 : index
    %185 = vector.load %arg2[%c0_41, %c25] : memref<4x36xf32, #tpu.memory_space<vmem>>, vector<4x1xf32>
    %186 = vector.extract_strided_slice %178 {offsets = [1, 0], sizes = [1, 256], strides = [1, 1]} : vector<4x256xf32> to vector<1x256xf32>
    %187 = vector.broadcast %185 : vector<4x1xf32> to vector<4x256xf32>
    %188 = vector.broadcast %186 : vector<1x256xf32> to vector<4x256xf32>
    %189 = arith.mulf %187, %188 : vector<4x256xf32>
    %190 = arith.addf %184, %189 : vector<4x256xf32>
    %c0_42 = arith.constant 0 : index
    %c26 = arith.constant 26 : index
    %191 = vector.load %arg2[%c0_42, %c26] : memref<4x36xf32, #tpu.memory_space<vmem>>, vector<4x1xf32>
    %192 = vector.extract_strided_slice %178 {offsets = [2, 0], sizes = [1, 256], strides = [1, 1]} : vector<4x256xf32> to vector<1x256xf32>
    %193 = vector.broadcast %191 : vector<4x1xf32> to vector<4x256xf32>
    %194 = vector.broadcast %192 : vector<1x256xf32> to vector<4x256xf32>
    %195 = arith.mulf %193, %194 : vector<4x256xf32>
    %196 = arith.addf %190, %195 : vector<4x256xf32>
    %c0_43 = arith.constant 0 : index
    %c27 = arith.constant 27 : index
    %197 = vector.load %arg2[%c0_43, %c27] : memref<4x36xf32, #tpu.memory_space<vmem>>, vector<4x1xf32>
    %198 = vector.extract_strided_slice %178 {offsets = [3, 0], sizes = [1, 256], strides = [1, 1]} : vector<4x256xf32> to vector<1x256xf32>
    %199 = vector.broadcast %197 : vector<4x1xf32> to vector<4x256xf32>
    %200 = vector.broadcast %198 : vector<1x256xf32> to vector<4x256xf32>
    %201 = arith.mulf %199, %200 : vector<4x256xf32>
    %202 = arith.addf %196, %201 : vector<4x256xf32>
    %c0_44 = arith.constant 0 : index
    %c28 = arith.constant 28 : index
    %203 = vector.load %arg2[%c0_44, %c28] : memref<4x36xf32, #tpu.memory_space<vmem>>, vector<4x1xf32>
    %204 = vector.extract_strided_slice %18 {offsets = [0, 0], sizes = [1, 256], strides = [1, 1]} : vector<4x256xf32> to vector<1x256xf32>
    %205 = vector.broadcast %203 : vector<4x1xf32> to vector<4x256xf32>
    %206 = vector.broadcast %204 : vector<1x256xf32> to vector<4x256xf32>
    %207 = arith.mulf %205, %206 : vector<4x256xf32>
    %208 = arith.addf %202, %207 : vector<4x256xf32>
    %c0_45 = arith.constant 0 : index
    %c29 = arith.constant 29 : index
    %209 = vector.load %arg2[%c0_45, %c29] : memref<4x36xf32, #tpu.memory_space<vmem>>, vector<4x1xf32>
    %210 = vector.extract_strided_slice %18 {offsets = [1, 0], sizes = [1, 256], strides = [1, 1]} : vector<4x256xf32> to vector<1x256xf32>
    %211 = vector.broadcast %209 : vector<4x1xf32> to vector<4x256xf32>
    %212 = vector.broadcast %210 : vector<1x256xf32> to vector<4x256xf32>
    %213 = arith.mulf %211, %212 : vector<4x256xf32>
    %214 = arith.addf %208, %213 : vector<4x256xf32>
    %c0_46 = arith.constant 0 : index
    %c30 = arith.constant 30 : index
    %215 = vector.load %arg2[%c0_46, %c30] : memref<4x36xf32, #tpu.memory_space<vmem>>, vector<4x1xf32>
    %216 = vector.extract_strided_slice %18 {offsets = [2, 0], sizes = [1, 256], strides = [1, 1]} : vector<4x256xf32> to vector<1x256xf32>
    %217 = vector.broadcast %215 : vector<4x1xf32> to vector<4x256xf32>
    %218 = vector.broadcast %216 : vector<1x256xf32> to vector<4x256xf32>
    %219 = arith.mulf %217, %218 : vector<4x256xf32>
    %220 = arith.addf %214, %219 : vector<4x256xf32>
    %c0_47 = arith.constant 0 : index
    %c31 = arith.constant 31 : index
    %221 = vector.load %arg2[%c0_47, %c31] : memref<4x36xf32, #tpu.memory_space<vmem>>, vector<4x1xf32>
    %222 = vector.extract_strided_slice %18 {offsets = [3, 0], sizes = [1, 256], strides = [1, 1]} : vector<4x256xf32> to vector<1x256xf32>
    %223 = vector.broadcast %221 : vector<4x1xf32> to vector<4x256xf32>
    %224 = vector.broadcast %222 : vector<1x256xf32> to vector<4x256xf32>
    %225 = arith.mulf %223, %224 : vector<4x256xf32>
    %226 = arith.addf %220, %225 : vector<4x256xf32>
    %c255_i32_48 = arith.constant 255 : i32
    %227 = tpu.dynamic_rotate %18 by %c255_i32_48 dim 1 : vector<4x256xf32>, i32 -> vector<4x256xf32>
    %c1_i32_49 = arith.constant 1 : i32
    %228 = tpu.dynamic_rotate %18 by %c1_i32_49 dim 1 : vector<4x256xf32>, i32 -> vector<4x256xf32>
    %229 = arith.select %12, %228, %227 : vector<4x256xi1>, vector<4x256xf32>
    %c0_50 = arith.constant 0 : index
    %c32 = arith.constant 32 : index
    %230 = vector.load %arg2[%c0_50, %c32] : memref<4x36xf32, #tpu.memory_space<vmem>>, vector<4x1xf32>
    %231 = vector.extract_strided_slice %229 {offsets = [0, 0], sizes = [1, 256], strides = [1, 1]} : vector<4x256xf32> to vector<1x256xf32>
    %232 = vector.broadcast %230 : vector<4x1xf32> to vector<4x256xf32>
    %233 = vector.broadcast %231 : vector<1x256xf32> to vector<4x256xf32>
    %234 = arith.mulf %232, %233 : vector<4x256xf32>
    %235 = arith.addf %226, %234 : vector<4x256xf32>
    %c0_51 = arith.constant 0 : index
    %c33 = arith.constant 33 : index
    %236 = vector.load %arg2[%c0_51, %c33] : memref<4x36xf32, #tpu.memory_space<vmem>>, vector<4x1xf32>
    %237 = vector.extract_strided_slice %229 {offsets = [1, 0], sizes = [1, 256], strides = [1, 1]} : vector<4x256xf32> to vector<1x256xf32>
    %238 = vector.broadcast %236 : vector<4x1xf32> to vector<4x256xf32>
    %239 = vector.broadcast %237 : vector<1x256xf32> to vector<4x256xf32>
    %240 = arith.mulf %238, %239 : vector<4x256xf32>
    %241 = arith.addf %235, %240 : vector<4x256xf32>
    %c0_52 = arith.constant 0 : index
    %c34 = arith.constant 34 : index
    %242 = vector.load %arg2[%c0_52, %c34] : memref<4x36xf32, #tpu.memory_space<vmem>>, vector<4x1xf32>
    %243 = vector.extract_strided_slice %229 {offsets = [2, 0], sizes = [1, 256], strides = [1, 1]} : vector<4x256xf32> to vector<1x256xf32>
    %244 = vector.broadcast %242 : vector<4x1xf32> to vector<4x256xf32>
    %245 = vector.broadcast %243 : vector<1x256xf32> to vector<4x256xf32>
    %246 = arith.mulf %244, %245 : vector<4x256xf32>
    %247 = arith.addf %241, %246 : vector<4x256xf32>
    %c0_53 = arith.constant 0 : index
    %c35 = arith.constant 35 : index
    %248 = vector.load %arg2[%c0_53, %c35] : memref<4x36xf32, #tpu.memory_space<vmem>>, vector<4x1xf32>
    %249 = vector.extract_strided_slice %229 {offsets = [3, 0], sizes = [1, 256], strides = [1, 1]} : vector<4x256xf32> to vector<1x256xf32>
    %250 = vector.broadcast %248 : vector<4x1xf32> to vector<4x256xf32>
    %251 = vector.broadcast %249 : vector<1x256xf32> to vector<4x256xf32>
    %252 = arith.mulf %250, %251 : vector<4x256xf32>
    %253 = arith.addf %247, %252 : vector<4x256xf32>
    %c0_54 = arith.constant 0 : index
    %c0_55 = arith.constant 0 : index
    %254 = vector.load %arg3[%c0_54, %c0_55] : memref<4x1xf32, #tpu.memory_space<vmem>>, vector<4x1xf32>
    %255 = vector.broadcast %254 : vector<4x1xf32> to vector<4x256xf32>
    %256 = arith.addf %253, %255 : vector<4x256xf32>
    %cst_56 = arith.constant 0.000000e+00 : f32
    %257 = vector.broadcast %cst_56 : f32 to vector<4x256xf32>
    %258 = arith.maximumf %256, %257 : vector<4x256xf32>
    %259 = tpu.iota {dimensions = array<i32: 1>} : vector<4x256xi32>
    %c16_i32_57 = arith.constant 16 : i32
    %260 = vector.broadcast %c16_i32_57 : i32 to vector<4x256xi32>
    %261 = arith.cmpi slt, %259, %260 : vector<4x256xi32>
    %c240_i32_58 = arith.constant 240 : i32
    %262 = vector.broadcast %c240_i32_58 : i32 to vector<4x256xi32>
    %263 = arith.cmpi sge, %259, %262 : vector<4x256xi32>
    %c15_i32_59 = arith.constant 15 : i32
    %264 = vector.broadcast %c15_i32_59 : i32 to vector<4x256xi32>
    %265 = arith.andi %259, %264 : vector<4x256xi32>
    %c0_i32_60 = arith.constant 0 : i32
    %266 = vector.broadcast %c0_i32_60 : i32 to vector<4x256xi32>
    %267 = arith.cmpi eq, %265, %266 : vector<4x256xi32>
    %c15_i32_61 = arith.constant 15 : i32
    %268 = vector.broadcast %c15_i32_61 : i32 to vector<4x256xi32>
    %269 = arith.cmpi eq, %265, %268 : vector<4x256xi32>
    %c16_i32_62 = arith.constant 16 : i32
    %270 = tpu.dynamic_rotate %258 by %c16_i32_62 dim 1 : vector<4x256xf32>, i32 -> vector<4x256xf32>
    %c240_i32_63 = arith.constant 240 : i32
    %271 = tpu.dynamic_rotate %258 by %c240_i32_63 dim 1 : vector<4x256xf32>, i32 -> vector<4x256xf32>
    %272 = arith.select %261, %271, %270 : vector<4x256xi1>, vector<4x256xf32>
    %c240_i32_64 = arith.constant 240 : i32
    %273 = tpu.dynamic_rotate %258 by %c240_i32_64 dim 1 : vector<4x256xf32>, i32 -> vector<4x256xf32>
    %c16_i32_65 = arith.constant 16 : i32
    %274 = tpu.dynamic_rotate %258 by %c16_i32_65 dim 1 : vector<4x256xf32>, i32 -> vector<4x256xf32>
    %275 = arith.select %263, %274, %273 : vector<4x256xi1>, vector<4x256xf32>
    %cst_66 = arith.constant 0.000000e+00 : f32
    %276 = vector.broadcast %cst_66 : f32 to vector<4x256xf32>
    %c1_i32_67 = arith.constant 1 : i32
    %277 = tpu.dynamic_rotate %272 by %c1_i32_67 dim 1 : vector<4x256xf32>, i32 -> vector<4x256xf32>
    %c255_i32_68 = arith.constant 255 : i32
    %278 = tpu.dynamic_rotate %272 by %c255_i32_68 dim 1 : vector<4x256xf32>, i32 -> vector<4x256xf32>
    %279 = arith.select %267, %278, %277 : vector<4x256xi1>, vector<4x256xf32>
    %c0_69 = arith.constant 0 : index
    %c0_70 = arith.constant 0 : index
    %280 = vector.load %arg4[%c0_69, %c0_70] : memref<4x36xf32, #tpu.memory_space<vmem>>, vector<4x1xf32>
    %281 = vector.extract_strided_slice %279 {offsets = [0, 0], sizes = [1, 256], strides = [1, 1]} : vector<4x256xf32> to vector<1x256xf32>
    %282 = vector.broadcast %280 : vector<4x1xf32> to vector<4x256xf32>
    %283 = vector.broadcast %281 : vector<1x256xf32> to vector<4x256xf32>
    %284 = arith.mulf %282, %283 : vector<4x256xf32>
    %285 = arith.addf %276, %284 : vector<4x256xf32>
    %c0_71 = arith.constant 0 : index
    %c1_72 = arith.constant 1 : index
    %286 = vector.load %arg4[%c0_71, %c1_72] : memref<4x36xf32, #tpu.memory_space<vmem>>, vector<4x1xf32>
    %287 = vector.extract_strided_slice %279 {offsets = [1, 0], sizes = [1, 256], strides = [1, 1]} : vector<4x256xf32> to vector<1x256xf32>
    %288 = vector.broadcast %286 : vector<4x1xf32> to vector<4x256xf32>
    %289 = vector.broadcast %287 : vector<1x256xf32> to vector<4x256xf32>
    %290 = arith.mulf %288, %289 : vector<4x256xf32>
    %291 = arith.addf %285, %290 : vector<4x256xf32>
    %c0_73 = arith.constant 0 : index
    %c2_74 = arith.constant 2 : index
    %292 = vector.load %arg4[%c0_73, %c2_74] : memref<4x36xf32, #tpu.memory_space<vmem>>, vector<4x1xf32>
    %293 = vector.extract_strided_slice %279 {offsets = [2, 0], sizes = [1, 256], strides = [1, 1]} : vector<4x256xf32> to vector<1x256xf32>
    %294 = vector.broadcast %292 : vector<4x1xf32> to vector<4x256xf32>
    %295 = vector.broadcast %293 : vector<1x256xf32> to vector<4x256xf32>
    %296 = arith.mulf %294, %295 : vector<4x256xf32>
    %297 = arith.addf %291, %296 : vector<4x256xf32>
    %c0_75 = arith.constant 0 : index
    %c3_76 = arith.constant 3 : index
    %298 = vector.load %arg4[%c0_75, %c3_76] : memref<4x36xf32, #tpu.memory_space<vmem>>, vector<4x1xf32>
    %299 = vector.extract_strided_slice %279 {offsets = [3, 0], sizes = [1, 256], strides = [1, 1]} : vector<4x256xf32> to vector<1x256xf32>
    %300 = vector.broadcast %298 : vector<4x1xf32> to vector<4x256xf32>
    %301 = vector.broadcast %299 : vector<1x256xf32> to vector<4x256xf32>
    %302 = arith.mulf %300, %301 : vector<4x256xf32>
    %303 = arith.addf %297, %302 : vector<4x256xf32>
    %c0_77 = arith.constant 0 : index
    %c4_78 = arith.constant 4 : index
    %304 = vector.load %arg4[%c0_77, %c4_78] : memref<4x36xf32, #tpu.memory_space<vmem>>, vector<4x1xf32>
    %305 = vector.extract_strided_slice %272 {offsets = [0, 0], sizes = [1, 256], strides = [1, 1]} : vector<4x256xf32> to vector<1x256xf32>
    %306 = vector.broadcast %304 : vector<4x1xf32> to vector<4x256xf32>
    %307 = vector.broadcast %305 : vector<1x256xf32> to vector<4x256xf32>
    %308 = arith.mulf %306, %307 : vector<4x256xf32>
    %309 = arith.addf %303, %308 : vector<4x256xf32>
    %c0_79 = arith.constant 0 : index
    %c5_80 = arith.constant 5 : index
    %310 = vector.load %arg4[%c0_79, %c5_80] : memref<4x36xf32, #tpu.memory_space<vmem>>, vector<4x1xf32>
    %311 = vector.extract_strided_slice %272 {offsets = [1, 0], sizes = [1, 256], strides = [1, 1]} : vector<4x256xf32> to vector<1x256xf32>
    %312 = vector.broadcast %310 : vector<4x1xf32> to vector<4x256xf32>
    %313 = vector.broadcast %311 : vector<1x256xf32> to vector<4x256xf32>
    %314 = arith.mulf %312, %313 : vector<4x256xf32>
    %315 = arith.addf %309, %314 : vector<4x256xf32>
    %c0_81 = arith.constant 0 : index
    %c6_82 = arith.constant 6 : index
    %316 = vector.load %arg4[%c0_81, %c6_82] : memref<4x36xf32, #tpu.memory_space<vmem>>, vector<4x1xf32>
    %317 = vector.extract_strided_slice %272 {offsets = [2, 0], sizes = [1, 256], strides = [1, 1]} : vector<4x256xf32> to vector<1x256xf32>
    %318 = vector.broadcast %316 : vector<4x1xf32> to vector<4x256xf32>
    %319 = vector.broadcast %317 : vector<1x256xf32> to vector<4x256xf32>
    %320 = arith.mulf %318, %319 : vector<4x256xf32>
    %321 = arith.addf %315, %320 : vector<4x256xf32>
    %c0_83 = arith.constant 0 : index
    %c7_84 = arith.constant 7 : index
    %322 = vector.load %arg4[%c0_83, %c7_84] : memref<4x36xf32, #tpu.memory_space<vmem>>, vector<4x1xf32>
    %323 = vector.extract_strided_slice %272 {offsets = [3, 0], sizes = [1, 256], strides = [1, 1]} : vector<4x256xf32> to vector<1x256xf32>
    %324 = vector.broadcast %322 : vector<4x1xf32> to vector<4x256xf32>
    %325 = vector.broadcast %323 : vector<1x256xf32> to vector<4x256xf32>
    %326 = arith.mulf %324, %325 : vector<4x256xf32>
    %327 = arith.addf %321, %326 : vector<4x256xf32>
    %c255_i32_85 = arith.constant 255 : i32
    %328 = tpu.dynamic_rotate %272 by %c255_i32_85 dim 1 : vector<4x256xf32>, i32 -> vector<4x256xf32>
    %c1_i32_86 = arith.constant 1 : i32
    %329 = tpu.dynamic_rotate %272 by %c1_i32_86 dim 1 : vector<4x256xf32>, i32 -> vector<4x256xf32>
    %330 = arith.select %269, %329, %328 : vector<4x256xi1>, vector<4x256xf32>
    %c0_87 = arith.constant 0 : index
    %c8_88 = arith.constant 8 : index
    %331 = vector.load %arg4[%c0_87, %c8_88] : memref<4x36xf32, #tpu.memory_space<vmem>>, vector<4x1xf32>
    %332 = vector.extract_strided_slice %330 {offsets = [0, 0], sizes = [1, 256], strides = [1, 1]} : vector<4x256xf32> to vector<1x256xf32>
    %333 = vector.broadcast %331 : vector<4x1xf32> to vector<4x256xf32>
    %334 = vector.broadcast %332 : vector<1x256xf32> to vector<4x256xf32>
    %335 = arith.mulf %333, %334 : vector<4x256xf32>
    %336 = arith.addf %327, %335 : vector<4x256xf32>
    %c0_89 = arith.constant 0 : index
    %c9_90 = arith.constant 9 : index
    %337 = vector.load %arg4[%c0_89, %c9_90] : memref<4x36xf32, #tpu.memory_space<vmem>>, vector<4x1xf32>
    %338 = vector.extract_strided_slice %330 {offsets = [1, 0], sizes = [1, 256], strides = [1, 1]} : vector<4x256xf32> to vector<1x256xf32>
    %339 = vector.broadcast %337 : vector<4x1xf32> to vector<4x256xf32>
    %340 = vector.broadcast %338 : vector<1x256xf32> to vector<4x256xf32>
    %341 = arith.mulf %339, %340 : vector<4x256xf32>
    %342 = arith.addf %336, %341 : vector<4x256xf32>
    %c0_91 = arith.constant 0 : index
    %c10_92 = arith.constant 10 : index
    %343 = vector.load %arg4[%c0_91, %c10_92] : memref<4x36xf32, #tpu.memory_space<vmem>>, vector<4x1xf32>
    %344 = vector.extract_strided_slice %330 {offsets = [2, 0], sizes = [1, 256], strides = [1, 1]} : vector<4x256xf32> to vector<1x256xf32>
    %345 = vector.broadcast %343 : vector<4x1xf32> to vector<4x256xf32>
    %346 = vector.broadcast %344 : vector<1x256xf32> to vector<4x256xf32>
    %347 = arith.mulf %345, %346 : vector<4x256xf32>
    %348 = arith.addf %342, %347 : vector<4x256xf32>
    %c0_93 = arith.constant 0 : index
    %c11_94 = arith.constant 11 : index
    %349 = vector.load %arg4[%c0_93, %c11_94] : memref<4x36xf32, #tpu.memory_space<vmem>>, vector<4x1xf32>
    %350 = vector.extract_strided_slice %330 {offsets = [3, 0], sizes = [1, 256], strides = [1, 1]} : vector<4x256xf32> to vector<1x256xf32>
    %351 = vector.broadcast %349 : vector<4x1xf32> to vector<4x256xf32>
    %352 = vector.broadcast %350 : vector<1x256xf32> to vector<4x256xf32>
    %353 = arith.mulf %351, %352 : vector<4x256xf32>
    %354 = arith.addf %348, %353 : vector<4x256xf32>
    %c1_i32_95 = arith.constant 1 : i32
    %355 = tpu.dynamic_rotate %258 by %c1_i32_95 dim 1 : vector<4x256xf32>, i32 -> vector<4x256xf32>
    %c255_i32_96 = arith.constant 255 : i32
    %356 = tpu.dynamic_rotate %258 by %c255_i32_96 dim 1 : vector<4x256xf32>, i32 -> vector<4x256xf32>
    %357 = arith.select %267, %356, %355 : vector<4x256xi1>, vector<4x256xf32>
    %c0_97 = arith.constant 0 : index
    %c12_98 = arith.constant 12 : index
    %358 = vector.load %arg4[%c0_97, %c12_98] : memref<4x36xf32, #tpu.memory_space<vmem>>, vector<4x1xf32>
    %359 = vector.extract_strided_slice %357 {offsets = [0, 0], sizes = [1, 256], strides = [1, 1]} : vector<4x256xf32> to vector<1x256xf32>
    %360 = vector.broadcast %358 : vector<4x1xf32> to vector<4x256xf32>
    %361 = vector.broadcast %359 : vector<1x256xf32> to vector<4x256xf32>
    %362 = arith.mulf %360, %361 : vector<4x256xf32>
    %363 = arith.addf %354, %362 : vector<4x256xf32>
    %c0_99 = arith.constant 0 : index
    %c13_100 = arith.constant 13 : index
    %364 = vector.load %arg4[%c0_99, %c13_100] : memref<4x36xf32, #tpu.memory_space<vmem>>, vector<4x1xf32>
    %365 = vector.extract_strided_slice %357 {offsets = [1, 0], sizes = [1, 256], strides = [1, 1]} : vector<4x256xf32> to vector<1x256xf32>
    %366 = vector.broadcast %364 : vector<4x1xf32> to vector<4x256xf32>
    %367 = vector.broadcast %365 : vector<1x256xf32> to vector<4x256xf32>
    %368 = arith.mulf %366, %367 : vector<4x256xf32>
    %369 = arith.addf %363, %368 : vector<4x256xf32>
    %c0_101 = arith.constant 0 : index
    %c14_102 = arith.constant 14 : index
    %370 = vector.load %arg4[%c0_101, %c14_102] : memref<4x36xf32, #tpu.memory_space<vmem>>, vector<4x1xf32>
    %371 = vector.extract_strided_slice %357 {offsets = [2, 0], sizes = [1, 256], strides = [1, 1]} : vector<4x256xf32> to vector<1x256xf32>
    %372 = vector.broadcast %370 : vector<4x1xf32> to vector<4x256xf32>
    %373 = vector.broadcast %371 : vector<1x256xf32> to vector<4x256xf32>
    %374 = arith.mulf %372, %373 : vector<4x256xf32>
    %375 = arith.addf %369, %374 : vector<4x256xf32>
    %c0_103 = arith.constant 0 : index
    %c15_104 = arith.constant 15 : index
    %376 = vector.load %arg4[%c0_103, %c15_104] : memref<4x36xf32, #tpu.memory_space<vmem>>, vector<4x1xf32>
    %377 = vector.extract_strided_slice %357 {offsets = [3, 0], sizes = [1, 256], strides = [1, 1]} : vector<4x256xf32> to vector<1x256xf32>
    %378 = vector.broadcast %376 : vector<4x1xf32> to vector<4x256xf32>
    %379 = vector.broadcast %377 : vector<1x256xf32> to vector<4x256xf32>
    %380 = arith.mulf %378, %379 : vector<4x256xf32>
    %381 = arith.addf %375, %380 : vector<4x256xf32>
    %c0_105 = arith.constant 0 : index
    %c16_106 = arith.constant 16 : index
    %382 = vector.load %arg4[%c0_105, %c16_106] : memref<4x36xf32, #tpu.memory_space<vmem>>, vector<4x1xf32>
    %383 = vector.extract_strided_slice %258 {offsets = [0, 0], sizes = [1, 256], strides = [1, 1]} : vector<4x256xf32> to vector<1x256xf32>
    %384 = vector.broadcast %382 : vector<4x1xf32> to vector<4x256xf32>
    %385 = vector.broadcast %383 : vector<1x256xf32> to vector<4x256xf32>
    %386 = arith.mulf %384, %385 : vector<4x256xf32>
    %387 = arith.addf %381, %386 : vector<4x256xf32>
    %c0_107 = arith.constant 0 : index
    %c17_108 = arith.constant 17 : index
    %388 = vector.load %arg4[%c0_107, %c17_108] : memref<4x36xf32, #tpu.memory_space<vmem>>, vector<4x1xf32>
    %389 = vector.extract_strided_slice %258 {offsets = [1, 0], sizes = [1, 256], strides = [1, 1]} : vector<4x256xf32> to vector<1x256xf32>
    %390 = vector.broadcast %388 : vector<4x1xf32> to vector<4x256xf32>
    %391 = vector.broadcast %389 : vector<1x256xf32> to vector<4x256xf32>
    %392 = arith.mulf %390, %391 : vector<4x256xf32>
    %393 = arith.addf %387, %392 : vector<4x256xf32>
    %c0_109 = arith.constant 0 : index
    %c18_110 = arith.constant 18 : index
    %394 = vector.load %arg4[%c0_109, %c18_110] : memref<4x36xf32, #tpu.memory_space<vmem>>, vector<4x1xf32>
    %395 = vector.extract_strided_slice %258 {offsets = [2, 0], sizes = [1, 256], strides = [1, 1]} : vector<4x256xf32> to vector<1x256xf32>
    %396 = vector.broadcast %394 : vector<4x1xf32> to vector<4x256xf32>
    %397 = vector.broadcast %395 : vector<1x256xf32> to vector<4x256xf32>
    %398 = arith.mulf %396, %397 : vector<4x256xf32>
    %399 = arith.addf %393, %398 : vector<4x256xf32>
    %c0_111 = arith.constant 0 : index
    %c19_112 = arith.constant 19 : index
    %400 = vector.load %arg4[%c0_111, %c19_112] : memref<4x36xf32, #tpu.memory_space<vmem>>, vector<4x1xf32>
    %401 = vector.extract_strided_slice %258 {offsets = [3, 0], sizes = [1, 256], strides = [1, 1]} : vector<4x256xf32> to vector<1x256xf32>
    %402 = vector.broadcast %400 : vector<4x1xf32> to vector<4x256xf32>
    %403 = vector.broadcast %401 : vector<1x256xf32> to vector<4x256xf32>
    %404 = arith.mulf %402, %403 : vector<4x256xf32>
    %405 = arith.addf %399, %404 : vector<4x256xf32>
    %c255_i32_113 = arith.constant 255 : i32
    %406 = tpu.dynamic_rotate %258 by %c255_i32_113 dim 1 : vector<4x256xf32>, i32 -> vector<4x256xf32>
    %c1_i32_114 = arith.constant 1 : i32
    %407 = tpu.dynamic_rotate %258 by %c1_i32_114 dim 1 : vector<4x256xf32>, i32 -> vector<4x256xf32>
    %408 = arith.select %269, %407, %406 : vector<4x256xi1>, vector<4x256xf32>
    %c0_115 = arith.constant 0 : index
    %c20_116 = arith.constant 20 : index
    %409 = vector.load %arg4[%c0_115, %c20_116] : memref<4x36xf32, #tpu.memory_space<vmem>>, vector<4x1xf32>
    %410 = vector.extract_strided_slice %408 {offsets = [0, 0], sizes = [1, 256], strides = [1, 1]} : vector<4x256xf32> to vector<1x256xf32>
    %411 = vector.broadcast %409 : vector<4x1xf32> to vector<4x256xf32>
    %412 = vector.broadcast %410 : vector<1x256xf32> to vector<4x256xf32>
    %413 = arith.mulf %411, %412 : vector<4x256xf32>
    %414 = arith.addf %405, %413 : vector<4x256xf32>
    %c0_117 = arith.constant 0 : index
    %c21_118 = arith.constant 21 : index
    %415 = vector.load %arg4[%c0_117, %c21_118] : memref<4x36xf32, #tpu.memory_space<vmem>>, vector<4x1xf32>
    %416 = vector.extract_strided_slice %408 {offsets = [1, 0], sizes = [1, 256], strides = [1, 1]} : vector<4x256xf32> to vector<1x256xf32>
    %417 = vector.broadcast %415 : vector<4x1xf32> to vector<4x256xf32>
    %418 = vector.broadcast %416 : vector<1x256xf32> to vector<4x256xf32>
    %419 = arith.mulf %417, %418 : vector<4x256xf32>
    %420 = arith.addf %414, %419 : vector<4x256xf32>
    %c0_119 = arith.constant 0 : index
    %c22_120 = arith.constant 22 : index
    %421 = vector.load %arg4[%c0_119, %c22_120] : memref<4x36xf32, #tpu.memory_space<vmem>>, vector<4x1xf32>
    %422 = vector.extract_strided_slice %408 {offsets = [2, 0], sizes = [1, 256], strides = [1, 1]} : vector<4x256xf32> to vector<1x256xf32>
    %423 = vector.broadcast %421 : vector<4x1xf32> to vector<4x256xf32>
    %424 = vector.broadcast %422 : vector<1x256xf32> to vector<4x256xf32>
    %425 = arith.mulf %423, %424 : vector<4x256xf32>
    %426 = arith.addf %420, %425 : vector<4x256xf32>
    %c0_121 = arith.constant 0 : index
    %c23_122 = arith.constant 23 : index
    %427 = vector.load %arg4[%c0_121, %c23_122] : memref<4x36xf32, #tpu.memory_space<vmem>>, vector<4x1xf32>
    %428 = vector.extract_strided_slice %408 {offsets = [3, 0], sizes = [1, 256], strides = [1, 1]} : vector<4x256xf32> to vector<1x256xf32>
    %429 = vector.broadcast %427 : vector<4x1xf32> to vector<4x256xf32>
    %430 = vector.broadcast %428 : vector<1x256xf32> to vector<4x256xf32>
    %431 = arith.mulf %429, %430 : vector<4x256xf32>
    %432 = arith.addf %426, %431 : vector<4x256xf32>
    %c1_i32_123 = arith.constant 1 : i32
    %433 = tpu.dynamic_rotate %275 by %c1_i32_123 dim 1 : vector<4x256xf32>, i32 -> vector<4x256xf32>
    %c255_i32_124 = arith.constant 255 : i32
    %434 = tpu.dynamic_rotate %275 by %c255_i32_124 dim 1 : vector<4x256xf32>, i32 -> vector<4x256xf32>
    %435 = arith.select %267, %434, %433 : vector<4x256xi1>, vector<4x256xf32>
    %c0_125 = arith.constant 0 : index
    %c24_126 = arith.constant 24 : index
    %436 = vector.load %arg4[%c0_125, %c24_126] : memref<4x36xf32, #tpu.memory_space<vmem>>, vector<4x1xf32>
    %437 = vector.extract_strided_slice %435 {offsets = [0, 0], sizes = [1, 256], strides = [1, 1]} : vector<4x256xf32> to vector<1x256xf32>
    %438 = vector.broadcast %436 : vector<4x1xf32> to vector<4x256xf32>
    %439 = vector.broadcast %437 : vector<1x256xf32> to vector<4x256xf32>
    %440 = arith.mulf %438, %439 : vector<4x256xf32>
    %441 = arith.addf %432, %440 : vector<4x256xf32>
    %c0_127 = arith.constant 0 : index
    %c25_128 = arith.constant 25 : index
    %442 = vector.load %arg4[%c0_127, %c25_128] : memref<4x36xf32, #tpu.memory_space<vmem>>, vector<4x1xf32>
    %443 = vector.extract_strided_slice %435 {offsets = [1, 0], sizes = [1, 256], strides = [1, 1]} : vector<4x256xf32> to vector<1x256xf32>
    %444 = vector.broadcast %442 : vector<4x1xf32> to vector<4x256xf32>
    %445 = vector.broadcast %443 : vector<1x256xf32> to vector<4x256xf32>
    %446 = arith.mulf %444, %445 : vector<4x256xf32>
    %447 = arith.addf %441, %446 : vector<4x256xf32>
    %c0_129 = arith.constant 0 : index
    %c26_130 = arith.constant 26 : index
    %448 = vector.load %arg4[%c0_129, %c26_130] : memref<4x36xf32, #tpu.memory_space<vmem>>, vector<4x1xf32>
    %449 = vector.extract_strided_slice %435 {offsets = [2, 0], sizes = [1, 256], strides = [1, 1]} : vector<4x256xf32> to vector<1x256xf32>
    %450 = vector.broadcast %448 : vector<4x1xf32> to vector<4x256xf32>
    %451 = vector.broadcast %449 : vector<1x256xf32> to vector<4x256xf32>
    %452 = arith.mulf %450, %451 : vector<4x256xf32>
    %453 = arith.addf %447, %452 : vector<4x256xf32>
    %c0_131 = arith.constant 0 : index
    %c27_132 = arith.constant 27 : index
    %454 = vector.load %arg4[%c0_131, %c27_132] : memref<4x36xf32, #tpu.memory_space<vmem>>, vector<4x1xf32>
    %455 = vector.extract_strided_slice %435 {offsets = [3, 0], sizes = [1, 256], strides = [1, 1]} : vector<4x256xf32> to vector<1x256xf32>
    %456 = vector.broadcast %454 : vector<4x1xf32> to vector<4x256xf32>
    %457 = vector.broadcast %455 : vector<1x256xf32> to vector<4x256xf32>
    %458 = arith.mulf %456, %457 : vector<4x256xf32>
    %459 = arith.addf %453, %458 : vector<4x256xf32>
    %c0_133 = arith.constant 0 : index
    %c28_134 = arith.constant 28 : index
    %460 = vector.load %arg4[%c0_133, %c28_134] : memref<4x36xf32, #tpu.memory_space<vmem>>, vector<4x1xf32>
    %461 = vector.extract_strided_slice %275 {offsets = [0, 0], sizes = [1, 256], strides = [1, 1]} : vector<4x256xf32> to vector<1x256xf32>
    %462 = vector.broadcast %460 : vector<4x1xf32> to vector<4x256xf32>
    %463 = vector.broadcast %461 : vector<1x256xf32> to vector<4x256xf32>
    %464 = arith.mulf %462, %463 : vector<4x256xf32>
    %465 = arith.addf %459, %464 : vector<4x256xf32>
    %c0_135 = arith.constant 0 : index
    %c29_136 = arith.constant 29 : index
    %466 = vector.load %arg4[%c0_135, %c29_136] : memref<4x36xf32, #tpu.memory_space<vmem>>, vector<4x1xf32>
    %467 = vector.extract_strided_slice %275 {offsets = [1, 0], sizes = [1, 256], strides = [1, 1]} : vector<4x256xf32> to vector<1x256xf32>
    %468 = vector.broadcast %466 : vector<4x1xf32> to vector<4x256xf32>
    %469 = vector.broadcast %467 : vector<1x256xf32> to vector<4x256xf32>
    %470 = arith.mulf %468, %469 : vector<4x256xf32>
    %471 = arith.addf %465, %470 : vector<4x256xf32>
    %c0_137 = arith.constant 0 : index
    %c30_138 = arith.constant 30 : index
    %472 = vector.load %arg4[%c0_137, %c30_138] : memref<4x36xf32, #tpu.memory_space<vmem>>, vector<4x1xf32>
    %473 = vector.extract_strided_slice %275 {offsets = [2, 0], sizes = [1, 256], strides = [1, 1]} : vector<4x256xf32> to vector<1x256xf32>
    %474 = vector.broadcast %472 : vector<4x1xf32> to vector<4x256xf32>
    %475 = vector.broadcast %473 : vector<1x256xf32> to vector<4x256xf32>
    %476 = arith.mulf %474, %475 : vector<4x256xf32>
    %477 = arith.addf %471, %476 : vector<4x256xf32>
    %c0_139 = arith.constant 0 : index
    %c31_140 = arith.constant 31 : index
    %478 = vector.load %arg4[%c0_139, %c31_140] : memref<4x36xf32, #tpu.memory_space<vmem>>, vector<4x1xf32>
    %479 = vector.extract_strided_slice %275 {offsets = [3, 0], sizes = [1, 256], strides = [1, 1]} : vector<4x256xf32> to vector<1x256xf32>
    %480 = vector.broadcast %478 : vector<4x1xf32> to vector<4x256xf32>
    %481 = vector.broadcast %479 : vector<1x256xf32> to vector<4x256xf32>
    %482 = arith.mulf %480, %481 : vector<4x256xf32>
    %483 = arith.addf %477, %482 : vector<4x256xf32>
    %c255_i32_141 = arith.constant 255 : i32
    %484 = tpu.dynamic_rotate %275 by %c255_i32_141 dim 1 : vector<4x256xf32>, i32 -> vector<4x256xf32>
    %c1_i32_142 = arith.constant 1 : i32
    %485 = tpu.dynamic_rotate %275 by %c1_i32_142 dim 1 : vector<4x256xf32>, i32 -> vector<4x256xf32>
    %486 = arith.select %269, %485, %484 : vector<4x256xi1>, vector<4x256xf32>
    %c0_143 = arith.constant 0 : index
    %c32_144 = arith.constant 32 : index
    %487 = vector.load %arg4[%c0_143, %c32_144] : memref<4x36xf32, #tpu.memory_space<vmem>>, vector<4x1xf32>
    %488 = vector.extract_strided_slice %486 {offsets = [0, 0], sizes = [1, 256], strides = [1, 1]} : vector<4x256xf32> to vector<1x256xf32>
    %489 = vector.broadcast %487 : vector<4x1xf32> to vector<4x256xf32>
    %490 = vector.broadcast %488 : vector<1x256xf32> to vector<4x256xf32>
    %491 = arith.mulf %489, %490 : vector<4x256xf32>
    %492 = arith.addf %483, %491 : vector<4x256xf32>
    %c0_145 = arith.constant 0 : index
    %c33_146 = arith.constant 33 : index
    %493 = vector.load %arg4[%c0_145, %c33_146] : memref<4x36xf32, #tpu.memory_space<vmem>>, vector<4x1xf32>
    %494 = vector.extract_strided_slice %486 {offsets = [1, 0], sizes = [1, 256], strides = [1, 1]} : vector<4x256xf32> to vector<1x256xf32>
    %495 = vector.broadcast %493 : vector<4x1xf32> to vector<4x256xf32>
    %496 = vector.broadcast %494 : vector<1x256xf32> to vector<4x256xf32>
    %497 = arith.mulf %495, %496 : vector<4x256xf32>
    %498 = arith.addf %492, %497 : vector<4x256xf32>
    %c0_147 = arith.constant 0 : index
    %c34_148 = arith.constant 34 : index
    %499 = vector.load %arg4[%c0_147, %c34_148] : memref<4x36xf32, #tpu.memory_space<vmem>>, vector<4x1xf32>
    %500 = vector.extract_strided_slice %486 {offsets = [2, 0], sizes = [1, 256], strides = [1, 1]} : vector<4x256xf32> to vector<1x256xf32>
    %501 = vector.broadcast %499 : vector<4x1xf32> to vector<4x256xf32>
    %502 = vector.broadcast %500 : vector<1x256xf32> to vector<4x256xf32>
    %503 = arith.mulf %501, %502 : vector<4x256xf32>
    %504 = arith.addf %498, %503 : vector<4x256xf32>
    %c0_149 = arith.constant 0 : index
    %c35_150 = arith.constant 35 : index
    %505 = vector.load %arg4[%c0_149, %c35_150] : memref<4x36xf32, #tpu.memory_space<vmem>>, vector<4x1xf32>
    %506 = vector.extract_strided_slice %486 {offsets = [3, 0], sizes = [1, 256], strides = [1, 1]} : vector<4x256xf32> to vector<1x256xf32>
    %507 = vector.broadcast %505 : vector<4x1xf32> to vector<4x256xf32>
    %508 = vector.broadcast %506 : vector<1x256xf32> to vector<4x256xf32>
    %509 = arith.mulf %507, %508 : vector<4x256xf32>
    %510 = arith.addf %504, %509 : vector<4x256xf32>
    %c0_151 = arith.constant 0 : index
    %c0_152 = arith.constant 0 : index
    %511 = vector.load %arg5[%c0_151, %c0_152] : memref<4x1xf32, #tpu.memory_space<vmem>>, vector<4x1xf32>
    %512 = vector.broadcast %511 : vector<4x1xf32> to vector<4x256xf32>
    %513 = arith.addf %510, %512 : vector<4x256xf32>
    %cst_153 = arith.constant 0.000000e+00 : f32
    %514 = vector.broadcast %cst_153 : f32 to vector<4x256xf32>
    %515 = arith.maximumf %513, %514 : vector<4x256xf32>
    %c0_154 = arith.constant 0 : index
    %c0_155 = arith.constant 0 : index
    %c0_156 = arith.constant 0 : index
    %516 = vector.load %arg6[%c0_154, %c0_155, %c0_156] : memref<1x4x256xf32, #tpu.memory_space<vmem>>, vector<1x4x256xf32>
    %517 = vector.shape_cast %516 : vector<1x4x256xf32> to vector<4x256xf32>
    %518 = vector.shape_cast %515 : vector<4x256xf32> to vector<1x4x256xf32>
    tpu.vector_store %arg6[%c0_154, %c0_155, %c0_156], %518 {strides = array<i32>} : memref<1x4x256xf32, #tpu.memory_space<vmem>>, vector<1x4x256xf32>,
    return
  }
  func.func @transform_0(%arg0: i32) -> (i32, i32, i32) {
    %c0_i32 = arith.constant 0 : i32
    %c0_i32_0 = arith.constant 0 : i32
    %c0_i32_1 = arith.constant 0 : i32
    return %arg0, %c0_i32, %c0_i32_0 : i32, i32, i32
  }
  func.func @transform_1(%arg0: i32) -> (i32, i32) {
    %c0_i32 = arith.constant 0 : i32
    %c0_i32_0 = arith.constant 0 : i32
    %c0_i32_1 = arith.constant 0 : i32
    return %c0_i32, %c0_i32_0 : i32, i32
  }
  func.func @transform_2(%arg0: i32) -> (i32, i32) {
    %c0_i32 = arith.constant 0 : i32
    %c0_i32_0 = arith.constant 0 : i32
    %c0_i32_1 = arith.constant 0 : i32
    return %c0_i32, %c0_i32_0 : i32, i32
  }
  func.func @transform_3(%arg0: i32) -> (i32, i32) {
    %c0_i32 = arith.constant 0 : i32
    %c0_i32_0 = arith.constant 0 : i32
    %c0_i32_1 = arith.constant 0 : i32
    return %c0_i32, %c0_i32_0 : i32, i32
  }
  func.func @transform_4(%arg0: i32) -> (i32, i32) {
    %c0_i32 = arith.constant 0 : i32
    %c0_i32_0 = arith.constant 0 : i32
    %c0_i32_1 = arith.constant 0 : i32
    return %c0_i32, %c0_i32_0 : i32, i32
  }
  func.func @transform_5(%arg0: i32) -> (i32, i32, i32) {
    %c0_i32 = arith.constant 0 : i32
    %c0_i32_0 = arith.constant 0 : i32
    %c0_i32_1 = arith.constant 0 : i32
    return %arg0, %c0_i32, %c0_i32_0 : i32, i32, i32
  }
}

</mosaic_0001>

<bundles_post_ra>
// kernel: tpu_custom_call.1
= control target key start
LH: loop header
LB: loop body
LE: loop exit
PB: predicated region body
PF: predicated region fallthrough
CT: control target
= control target key end

     0   :  { %10 = vsyncpa [#allocation3], 0  ;;  %s2956_s0 = inlined_call_operand.hbm [shape: f32[2,4,256], index: 0, kind: input, shape index: {}]   ;;  %s2957_s1 = inlined_call_operand.vmem [shape: f32[4,36], index: 1, kind: input, shape index: {}]   ;;  %s2958_s2 = inlined_call_operand.vmem [shape: f32[4,1], index: 2, kind: input, shape index: {}]   ;;  %s2959_s3 = inlined_call_operand.vmem [shape: f32[4,36], index: 3, kind: input, shape index: {}]   ;;  %s2960_s4 = inlined_call_operand.vmem [shape: f32[4,1], index: 4, kind: input, shape index: {}]   ;;  %s2961_s5 = inlined_call_operand.hbm [shape: f32[2,4,256], index: 5, kind: output, shape index: {}]  }
   0x1   :  { %12 = vsyncpa [#allocation3 + $0x1], 0 }
   0x2   :  { %13 = vsyncpa [#allocation4], 0 }
   0x3   :  { %15 = vsyncpa [#allocation4 + $0x1], 0  ;;  %s2044_s18 = smov 0   ;;  %s2046_s19 = smov 0  }
   0x4   :  { %s2048_s20 = smov 0   ;;  %s2050_s21 = smov 0  }
   0x5 LB: > { %s2065_s22 = sadd.s32 4294967295, %s1970_s21   ;;  %s1697_s23 = sadd.s32 4294967294, %s1970_s21   ;;  %s1970_s21 = sphi %s2050_s21, %s3039_s21   ;;  %s1966_s20 = sphi %s2048_s20, %s3038_s20   ;;  %s1962_s19 = sphi %s2046_s19, %s3037_s19   ;;  %s1958_s18 = sphi %s2044_s18, %s3036_s18  }
   0x6   : > { %s2069_s24 = sadd.s32 1, %s1970_s21   ;;  %s28_s25 = sadd.s32 1, %s1966_s20 }
   0x7   : > { %s25_s26 = ssub.s32 %s1970_s21, %s2069_s24  ;;  %p35_p0 = scmp.ne.s32.totalorder %s1966_s20, %s1962_s19 }
   0x8   : > { %p26_p1 = scmp.eq.s32.totalorder %s25_s26, 0  ;;  %p36_p2 = scmp.eq.s32.totalorder %s1970_s21, 0 }
   0x9   : > { %p41_p3 = scmp.ne.s32.totalorder %s1962_s19, %s1958_s18  ;;  %p42_p4 = scmp.eq.s32.totalorder %s2065_s22, 0 }
   0xa   : > { %s2081_s27 = scalar_select %p26_p1, %s1966_s20, %s28_s25  }
   0xb   : > { %p2083_p5 = por %p36_p2, %p35_p0  ;;  %p2087_p6 = por %p42_p4, %p41_p3 }
   0xc   : > { %p149_p7 = scmp.eq.s32.totalorder %s2065_s22, 1  ;;  %p155_p8 = scmp.eq.s32.totalorder %s1697_s23, 1 }
   0xd   : > { %p1725_p10 = scmp.lt.s32.totalorder %s1970_s21, 2  ;;  %s187_s7 = sand.u32 1, %s1966_s20  }
   0xe   : > { %p2094_p11 = por %p149_p7, %p35_p0  ;;  %p2098_p12 = por %p155_p8, %p41_p3 }
   0xf   : > { %s1711_s8 = sshll.u32 %s1970_s21, 7  ;;  %s1700_s9 = sshll.u32 %s187_s7, 3 }
  0x10   : > { %s2993_s30 = scalar_select %p2094_p11, 1, 0 }
  0x11   : > { %s2994_s6 = scalar_select %p2098_p12, 1, 0 }
  0x12   : > { %s2107_s12 = scalar_lea.hbm %s2956_s0, %s1711_s8  ;;  %s191_s13 = scalar_lea.vmem [#allocation2], %s1700_s9 }
  0x13   : > { %s199_s14 = sshll.u32 %s191_s13, 4  ;;  %p2111_p13 = pnand %p1725_p10, %p2083_p5  ;;  %s2115_s14 = int_to_ptr.vmem [resolvable:$true] %s199_s14 }
  0x14   : > { %s188_s16 = scalar_lea.sflag [#allocation3], %s187_s7  ;;  %s1874_s17 = scalar_lea.hbm %s2107_s12, 128 }
  0x15   : > { %p1875_p2 = scmp.ne.s32.totalorder %s2107_s12, %s1874_s17  ;;  %p1876_p3 = pneg %p2111_p13 }
  0x16   : > { %s1879_s26 = scalar_lea.hbm %s2956_s0, 256  ;;  %p1880_p5 = scmp.lt.u32.totalorder %s2107_s12, %s2956_s0 }
  0x17   : > { %p1877_p4 = pnand %p1876_p3, %p1875_p2  ;;  %p1881_p8 = scmp.lt.u32.totalorder %s1879_s26, %s1874_s17 }
  0x18   : > { %p1883_p9 = scmp.lt.u32.totalorder %s1874_s17, %s2107_s12 }
  0x19   : > { %p1878_p7 = pneg %p1877_p4  ;;  %p1882_p10 = por %p1881_p8, %p1880_p5 }
  0x1b   : > { %p1884_p0 = por %p1883_p9, %p1882_p10 }
  0x1d   : > { %p1885_p1 = pnand %p1884_p0, %p1878_p7 }
  0x1f   : > { %1888 = shalt.err (!%p1885_p1)
}
  0x20   : > { %s1889_s7 = scalar_lea.vmem %s2115_s14, 128  ;;  %s1972_s9 = smov [#allocation2]  }
  0x21   : > { %p1890_p2 = scmp.ne.s32.totalorder %s2115_s14, %s1889_s7  ;;  %s1894_s10 = sshll.u32 %s1972_s9, 4  ;;  %s1895_s10 = int_to_ptr.vmem [resolvable:$false] %s1894_s10 }
  0x22   : > { %s1896_s11 = scalar_lea.vmem %s1895_s10, 256  ;;  %p1897_p11 = scmp.lt.s32.totalorder %s2115_s14, %s1895_s10 }
  0x23   : > { %p1892_p4 = pnand %p1890_p2, %p1876_p3  ;;  %p1898_p5 = scmp.lt.s32.totalorder %s1896_s11, %s1889_s7 }
  0x25   : > { %p1893_p12 = pneg %p1892_p4  ;;  %p1899_p8 = por %p1898_p5, %p1897_p11 }
  0x27   : > { %p1900_p9 = pnand %p1899_p8, %p1893_p12 }
  0x29   : > { %1903 = shalt.err (!%p1900_p9)
}
  0x2a   : > { %1720 = dma.hbm_to_vmem [thread:$0]  (!%p2111_p13), %s2107_s12, 128, %s2115_s14, %s188_s16  }
  0x2b   : > { %p2996_p0 = scmp.lt.s32.totalorder %s1970_s21, 3  ;;  %p2997_p1 = scmp.ge.s32.totalorder %s1970_s21, 1 }
  0x2d   : > { %p205_p3 = pnand %p2997_p1, %p2996_p0 }
  0x2e   : > { %s2149_s13 = sand.u32 (!%p205_p3), 1, %s1962_s19  }
  0x2f   : > { %208 = sbr.rel (%p205_p3) target bundleno = 752 (0x2f0), region = 40  ;;  %s1704_s17 = sshll.u32 (!%p205_p3), %s2149_s13, 3 }
  0x30   : > { %s211_s23 = scalar_lea.sflag (!%p205_p3), [#allocation3], %s2149_s13  ;;  %s214_s15 = scalar_lea.vmem (!%p205_p3), [#allocation2], %s1704_s17 }
  0x36   : > { %1949 = dma.done.wait (%p2087_p6), %s211_s23, 128  }
  0x37   : > { %1951 = vsyncadd (%p2087_p6), %s211_s23, 4294967168  ;;  %v1973_v0 = vmov 1   ;;  %v2967_v1 = vmov 0   ;;  %v2161_v2 = vld [vmem:[%s214_s15] sm:$0xff]  ;;  %s1975_s12 = smov 112   ;;  %s1976_s14 = smov 16   ;;  %v242_v20 = vlaneseq }
  0x38   : > { %1800 = vset.pattern.permute.xlu1 %v1973_v0  ;;  %1799 = vset.pattern.permute.xlu0 %v2967_v1  ;;  %v2169_v3 = vcombine.high %v2161_v2, %v2161_v2  ;;  %v291_v4 = vld [vmem:[%s2957_s1] sm:$0xf]  ;;  %v1977_v5 = vmov 2   ;;  %v1978_v6 = vmov 3   ;;  %v1979_v7 = vmov 4   ;;  %s1986_s28 = smov 1  }
  0x39   : > { %264 = vrot.lane.b32.xlu1 %v2161_v2, %s1975_s12  ;;  %258 = vrot.lane.b32.xlu0 %v2161_v2, %s1976_s14  ;;  %v1980_v8 = vmov 6   ;;  %v1981_v9 = vmov 5   ;;  %v2989_v10 = vmov 9   ;;  %v2187_v11 = vld [vmem:[%s2957_s1] sm:$0xf]  ;;  %v2990_v12 = vmov 7  }
  0x3a   : > { %v2987_v13 = vmov 12   ;;  %v1985_v14 = vmov 8   ;;  %v2985_v15 = vmov 15   ;;  %v2988_v16 = vmov 10   ;;  %s1992_s8 = smov 127   ;;  %p3033_p11 = scmp.ne.s32.totalorder %s2993_s30, 0 }
  0x3b   : > { %v1989_v17 = vmov 11   ;;  %v2986_v18 = vmov 13   ;;  %v1991_v19 = vmov 14   ;;  %v2206_v21 = vand.u32 127, %v242_v20  ;;  %v945_v48 = vld [vmem:[%s2958_s2] sm:$0xf] }
  0x3c   : > { %v2984_v30 = vmov 16   ;;  %v2983_v31 = vmov 18   ;;  %v2982_v32 = vmov 17   ;;  %v2979_v33 = vmov 21  }
  0x3d   : > { %266 = vrot.lane.b32.xlu1 %v2169_v3, %s1975_s12  ;;  %260 = vrot.lane.b32.xlu0 %v2169_v3, %s1976_s14  ;;  %vm268_vm0 = vcmp.lt.s32.totalorder %v2206_v21, 112  ;;  %vm245_vm1 = vcmp.lt.s32.totalorder %v2206_v21, 16  ;;  %v2981_v34 = vmov 19   ;;  %v2248_v35 = vadd.s32 128, %v2206_v21 }
  0x3e   : > { %v2975_v36 = vmov 24   ;;  %v2980_v37 = vmov 20   ;;  %v2977_v40 = vmov 22   ;;  %v2972_v41 = vmov 27  }
  0x3f   : > { %vm248_vm2 = vcmp.ge.s32.totalorder %v2248_v35, 240  ;;  %v2978_v42 = vmov 23   ;;  %v2974_v43 = vmov 25   ;;  %v2966_v44 = vmov 30  }
  0x40   : > { %v2976_v45 = vmov 26   ;;  %v2964_v46 = vmov 33   ;;  %v2970_v50 = vmov 28   ;;  %v2973_v52 = vmov 29  }
  0x41   : > { %310 = vperm.xlu1 %1800, %v291_v4   ;;  %294 = vperm.xlu0 %1799, %v291_v4   ;;  %v2965_v54 = vmov 31   ;;  %v2971_v56 = vmov 32   ;;  %v2963_v58 = vmov 34   ;;  %v2969_v60 = vmov 35  }
  0x42   : > { %vm286_vm3 = vcmp.lt.s32.totalorder %v2206_v21, 127  ;;  %vm279_vm6 = vcmp.lt.s32.totalorder %v2206_v21, 1 }
  0x45   : > { %1801 = vset.pattern.permute.xlu1 %v1977_v5  ;;  %1802 = vset.pattern.permute.xlu0 %v1978_v6 }
  0x46   : > { %326 = vperm.xlu1 %1801, %v291_v4   ;;  %342 = vperm.xlu0 %1802, %v291_v4  }
  0x4a   : > { %1803 = vset.pattern.permute.xlu1 %v1979_v7  ;;  %1805 = vset.pattern.permute.xlu0 %v1980_v8 }
  0x4b   : > { %358 = vperm.xlu1 %1803, %v291_v4   ;;  %390 = vperm.xlu0 %1805, %v291_v4  }
  0x4f   : > { %1804 = vset.pattern.permute.xlu1 %v1981_v9  ;;  %1808 = vset.pattern.permute.xlu0 %v2989_v10 }
  0x50   : > { %374 = vperm.xlu1 %1804, %v291_v4   ;;  %440 = vperm.xlu0 %1808, %v291_v4  }
  0x54   : > { %1806 = vset.pattern.permute.xlu1 %v2990_v12  ;;  %1811 = vset.pattern.permute.xlu0 %v2987_v13 }
  0x55   : > { %406 = vperm.xlu1 %1806, %v291_v4   ;;  %504 = vperm.xlu0 %1811, %v2187_v11  }
  0x59   : > { %1807 = vset.pattern.permute.xlu1 %v1985_v14  ;;  %489 = vrot.lane.b32.xlu0 %v2169_v3, %s1986_s28 }
  0x5a   : > { %424 = vperm.xlu1 %1807, %v291_v4   ;;  %1814 = vset.pattern.permute.xlu0 %v2985_v15 }
  0x5e   : > { %1809 = vset.pattern.permute.xlu1 %v2988_v16 }
  0x5f   : > { %456 = vperm.xlu1 %1809, %v291_v4  }
  0x63   : > { %1810 = vset.pattern.permute.xlu1 %v1989_v17 }
  0x64   : > { %472 = vperm.xlu1 %1810, %v291_v4  }
  0x68   : > { %1812 = vset.pattern.permute.xlu1 %v2986_v18 }
  0x69   : > { %520 = vperm.xlu1 %1812, %v2187_v11  }
  0x6d   : > { %487 = vrot.lane.b32.xlu1 %v2161_v2, %s1986_s28 }
  0x6e   : > { %1813 = vset.pattern.permute.xlu1 %v1991_v19 }
  0x71   : > { %493 = vrot.lane.b32.xlu1 %v2161_v2, %s1992_s8 }
  0xab   : > { %v265_v22 = vpop.permute.xlu1 %264  ;;  %v259_v23 = vpop.permute.xlu0 %258 }
  0xaf   : > { %v267_v24 = vpop.permute.xlu1 %266  ;;  %v261_v25 = vpop.permute.xlu0 %260 }
  0xb0   : > { %v2212_v26 = vsel %vm268_vm0, %v265_v22, %v267_v24  ;;  %v2216_v27 = vsel %vm245_vm1, %v259_v23, %v261_v25  ;;  %v263_v28 = vsel %vm245_vm1, %v261_v25, %v259_v23  ;;  %v270_v38 = vsel %vm268_vm0, %v267_v24, %v265_v22 }
  0xb1   : > { %v2223_v29 = vsel %vm245_vm1, %v2212_v26, %v263_v28  ;;  %277 = vrot.lane.b32.xlu1 %v2216_v27, %s1986_s28  ;;  %v2260_v39 = vsel %vm248_vm2, %v2216_v27, %v270_v38 }
  0xb2   : > { %275 = vrot.lane.b32.xlu0 %v2223_v29, %s1986_s28 }
  0xb5   : > { %284 = vrot.lane.b32.xlu1 %v2216_v27, %s1992_s8 }
  0xb6   : > { %282 = vrot.lane.b32.xlu0 %v2223_v29, %s1992_s8 }
  0xb9   : > { %536 = vperm.xlu1 %1813, %v2187_v11  }
  0xba   : > { %495 = vrot.lane.b32.xlu0 %v2169_v3, %s1992_s8 }
  0xbd   : > { %1815 = vset.pattern.permute.xlu1 %v2984_v30 }
  0xbe   : > { %552 = vperm.xlu0 %1814, %v2187_v11   ;;  %568 = vperm.xlu1 %1815, %v2187_v11  }
  0xc0   : > { %v2280_v47 = vpop.permute.xlu1 %310  ;;  %v295_v59 = vpop.permute.xlu0 %294 }
  0xc2   : > { %1817 = vset.pattern.permute.xlu0 %v2983_v31  ;;  %1816 = vset.pattern.permute.xlu1 %v2982_v32 }
  0xc3   : > { %620 = vperm.xlu0 %1817, %v2187_v11   ;;  %594 = vperm.xlu1 %1816, %v2187_v11  }
  0xc5   : > { %v2290_v49 = vpop.permute.xlu1 %326  ;;  %v343_v62 = vpop.permute.xlu0 %342 }
  0xc7   : > { %1820 = vset.pattern.permute.xlu0 %v2979_v33  ;;  %1818 = vset.pattern.permute.xlu1 %v2981_v34 }
  0xc8   : > { %690 = vperm.xlu0 %1820, %v2187_v11   ;;  %646 = vperm.xlu1 %1818, %v2187_v11  }
  0xca   : > { %v2294_v51 = vpop.permute.xlu1 %358  ;;  %v2317_v3 = vpop.permute.xlu0 %390 }
  0xcc   : > { %1823 = vset.pattern.permute.xlu0 %v2975_v36  ;;  %1819 = vset.pattern.permute.xlu1 %v2980_v37 }
  0xcd   : > { %752 = vperm.xlu0 %1823, %v2187_v11   ;;  %674 = vperm.xlu1 %1819, %v2187_v11  }
  0xcf   : > { %v2298_v53 = vpop.permute.xlu1 %374  ;;  %v2321_v22 = vpop.permute.xlu0 %440 }
  0xd1   : > { %1821 = vset.pattern.permute.xlu1 %v2977_v40  ;;  %739 = vrot.lane.b32.xlu0 %v2260_v39, %s1986_s28 }
  0xd2   : > { %706 = vperm.xlu1 %1821, %v2187_v11   ;;  %1826 = vset.pattern.permute.xlu0 %v2972_v41 }
  0xd4   : > { %v2302_v55 = vpop.permute.xlu1 %406  ;;  %v2325_v24 = vpop.permute.xlu0 %504 }
  0xd5   : > { %745 = vrot.lane.b32.xlu0 %v2260_v39, %s1992_s8 }
  0xd6   : > { %1822 = vset.pattern.permute.xlu1 %v2978_v42 }
  0xd7   : > { %722 = vperm.xlu1 %1822, %v2187_v11  }
  0xd8   : > { %v2329_v28 = vpop.permute.xlu0 %489 }
  0xd9   : > { %800 = vperm.xlu0 %1826, %v2187_v11   ;;  %v2306_v57 = vpop.permute.xlu1 %424 }
  0xdb   : > { %1824 = vset.pattern.permute.xlu1 %v2974_v43 }
  0xdc   : > { %768 = vperm.xlu1 %1824, %v2187_v11  }
  0xdd   : > { %1829 = vset.pattern.permute.xlu0 %v2966_v44 }
  0xde   : > { %848 = vperm.xlu0 %1829, %v2187_v11   ;;  %v2311_v61 = vpop.permute.xlu1 %456 }
  0xe0   : > { %737 = vrot.lane.b32.xlu1 %v2212_v26, %s1986_s28 }
  0xe1   : > { %1825 = vset.pattern.permute.xlu1 %v2976_v45 }
  0xe2   : > { %1832 = vset.pattern.permute.xlu0 %v2964_v46 }
  0xe3   : > { %898 = vperm.xlu0 %1832, %v2187_v11   ;;  %v2315_v63 = vpop.permute.xlu1 %472 }
  0xe4   : > { %743 = vrot.lane.b32.xlu1 %v2212_v26, %s1992_s8 }
  0xe7   : > { %1835 = vset.pattern.permute.xlu0 %v2967_v1 }
  0xe8   : > { %784 = vperm.xlu1 %1825, %v2187_v11   ;;  %948 = vperm.xlu0 %1835, %v945_v48   ;;  %v2319_v4 = vpop.permute.xlu1 %520  ;;  %v2334_v48 = vshrl.u32 %v242_v20, 7 }
  0xea   : > { %v2346_v1 = vsub.s32 0, %v2334_v48  ;;  %v2361_v43 = vsub.s32 2, %v2334_v48  ;;  %v2364_v36 = vsub.s32 3, %v2334_v48 }
  0xec   : > { %1827 = vset.pattern.permute.xlu1 %v2970_v50  ;;  %v2323_v23 = vpop.permute.xlu1 %487  ;;  %v364_v12 = vrot.slane %v2223_v29, %v2346_v1 }
  0xed   : > { %816 = vperm.xlu1 %1827, %v2187_v11  }
  0xf0   : > { %v2327_v25 = vpop.permute.xlu1 %493 }
  0xf1   : > { %1828 = vset.pattern.permute.xlu1 %v2973_v52 }
  0xf2   : > { %832 = vperm.xlu1 %1828, %v2187_v11  }
  0xf6   : > { %1830 = vset.pattern.permute.xlu1 %v2965_v54 }
  0xf7   : > { %864 = vperm.xlu1 %1830, %v2187_v11  }
  0xfb   : > { %1831 = vset.pattern.permute.xlu1 %v2971_v56 }
  0xfc   : > { %882 = vperm.xlu1 %1831, %v2187_v11  }
 0x100   : > { %1833 = vset.pattern.permute.xlu1 %v2963_v58 }
 0x101   : > { %914 = vperm.xlu1 %1833, %v2187_v11  }
 0x105   : > { %1834 = vset.pattern.permute.xlu1 %v2969_v60  ;;  %v2349_v60 = vsub.s32 1, %v2334_v48 }
 0x106   : > { %930 = vperm.xlu1 %1834, %v2187_v11   ;;  %v250_v11 = vand.u32 15, %v2248_v35 }
 0x108   : > { %vm2337_vm4 = vcmp.eq.s32.totalorder %v250_v11, 0  ;;  %vm2390_vm8 = vcmp.eq.s32.totalorder %v250_v11, 15 }
 0x10a   : > { %1836 = vset.pattern.permute.xlu1 %v1973_v0  ;;  %v249_v0 = vand.u32 15, %v2206_v21 }
 0x10c   : > { %vm2341_vm5 = vcmp.eq.s32.totalorder %v249_v0, 0  ;;  %vm2386_vm7 = vcmp.eq.s32.totalorder %v249_v0, 15 }
 0x123   : > { %v278_v38 = vpop.permute.xlu1 %277 }
 0x124   : > { %v276_v58 = vpop.permute.xlu0 %275 }
 0x125   : > { %v280_v50 = vsel %vm279_vm6, %v276_v58, %v278_v38  ;;  %v281_v56 = vsel %vm279_vm6, %v278_v38, %v276_v58 }
 0x127   : > { %v285_v54 = vpop.permute.xlu1 %284 }
 0x128   : > { %v283_v20 = vpop.permute.xlu0 %282 }
 0x129   : > { %v287_v41 = vsel %vm286_vm3, %v283_v20, %v285_v54  ;;  %v288_v52 = vsel %vm286_vm3, %v285_v54, %v283_v20 }
 0x12a   : > { %v289_v45 = vsel %vm2341_vm5, %v287_v41, %v281_v56  ;;  %v290_v40 = vsel %vm2337_vm4, %v288_v52, %v280_v50 }
 0x12b   : > { %v300_v58 = vrot.slane %v289_v45, %v2346_v1  ;;  %v304_v38 = vrot.slane %v290_v40, %v2346_v1  ;;  %v316_v42 = vrot.slane %v289_v45, %v2349_v60  ;;  %v320_v54 = vrot.slane %v290_v40, %v2349_v60 }
 0x12c   : > { %v332_v20 = vrot.slane %v289_v45, %v2361_v43  ;;  %v336_v33 = vrot.slane %v290_v40, %v2361_v43  ;;  %v348_v37 = vrot.slane %v289_v45, %v2364_v36  ;;  %v352_v34 = vrot.slane %v290_v40, %v2364_v36 }
 0x12d   : > { %v305_v32 = vmul.f32 %v300_v58, %v295_v59  ;;  %v306_v31 = vmul.f32 %v304_v38, %v295_v59  ;;  %v321_v30 = vmul.f32 %v316_v42, %v2280_v47  ;;  %v322_v15 = vmul.f32 %v320_v54, %v2280_v47 }
 0x12e   : > { %v337_v16 = vmul.f32 %v332_v20, %v2290_v49  ;;  %v338_v10 = vmul.f32 %v336_v33, %v2290_v49  ;;  %v368_v45 = vrot.slane %v2216_v27, %v2346_v1  ;;  %v400_v33 = vrot.slane %v2216_v27, %v2361_v43 }
 0x12f   : > { %v323_v18 = vadd.f32 %v321_v30, %v305_v32  ;;  %v324_v13 = vadd.f32 %v322_v15, %v306_v31  ;;  %v353_v31 = vmul.f32 %v348_v37, %v343_v62  ;;  %v354_v32 = vmul.f32 %v352_v34, %v343_v62 }
 0x130   : > { %v380_v47 = vrot.slane %v2223_v29, %v2349_v60  ;;  %v384_v49 = vrot.slane %v2216_v27, %v2349_v60  ;;  %v369_v59 = vmul.f32 %v364_v12, %v2294_v51  ;;  %v370_v11 = vmul.f32 %v368_v45, %v2294_v51 }
 0x131   : > { %v339_v30 = vadd.f32 %v337_v16, %v323_v18  ;;  %v340_v15 = vadd.f32 %v338_v10, %v324_v13  ;;  %v396_v10 = vrot.slane %v2223_v29, %v2361_v43  ;;  %v412_v13 = vrot.slane %v2223_v29, %v2364_v36  ;;  %v496_v29 = vpop.permute.xlu0 %495 }
 0x132   : > { %v421_v16 = vsel %vm2386_vm7, %v281_v56, %v287_v41  ;;  %v422_v18 = vsel %vm2390_vm8, %v280_v50, %v288_v52  ;;  %v385_v34 = vmul.f32 %v380_v47, %v2298_v53  ;;  %v386_v12 = vmul.f32 %v384_v49, %v2298_v53 }
 0x133   : > { %v355_v0 = vadd.f32 %v353_v31, %v339_v30  ;;  %v356_v58 = vadd.f32 %v354_v32, %v340_v15  ;;  %v401_v62 = vmul.f32 %v396_v10, %v2317_v3  ;;  %v402_v38 = vmul.f32 %v400_v33, %v2317_v3 }
 0x134   : > { %v416_v54 = vrot.slane %v2216_v27, %v2364_v36  ;;  %v577_v20 = vsub.s32 4, %v2334_v48  ;;  %v430_v50 = vrot.slane %v421_v16, %v2346_v1  ;;  %v434_v52 = vrot.slane %v422_v18, %v2346_v1 }
 0x135   : > { %v371_v37 = vadd.f32 %v369_v59, %v355_v0  ;;  %v372_v51 = vadd.f32 %v370_v11, %v356_v58  ;;  %v417_v53 = vmul.f32 %v412_v13, %v2302_v55  ;;  %v446_v30 = vrot.slane %v421_v16, %v2349_v60 }
 0x136   : > { %v418_v45 = vmul.f32 %v416_v54, %v2302_v55  ;;  %v450_v3 = vrot.slane %v422_v18, %v2349_v60  ;;  %v2426_v32 = vsel %vm286_vm3, %v2327_v25, %v496_v29  ;;  %v2431_v33 = vsel %vm286_vm3, %v496_v29, %v2327_v25 }
 0x137   : > { %v387_v41 = vadd.f32 %v385_v34, %v371_v37  ;;  %v388_v56 = vadd.f32 %v386_v12, %v372_v51  ;;  %v2437_v55 = vsel %vm279_vm6, %v2323_v23, %v2329_v28  ;;  %v2443_v47 = vsel %vm279_vm6, %v2329_v28, %v2323_v23 }
 0x138   : > { %v537_v15 = vpop.permute.xlu1 %536  ;;  %v462_v49 = vrot.slane %v421_v16, %v2361_v43  ;;  %v466_v59 = vrot.slane %v422_v18, %v2361_v43  ;;  %v435_v25 = vmul.f32 %v430_v50, %v2306_v57  ;;  %v436_v58 = vmul.f32 %v434_v52, %v2306_v57 }
 0x139   : > { %v403_v31 = vadd.f32 %v401_v62, %v387_v41  ;;  %v404_v27 = vadd.f32 %v402_v38, %v388_v56  ;;  %v478_v10 = vrot.slane %v421_v16, %v2364_v36  ;;  %v482_v13 = vrot.slane %v422_v18, %v2364_v36 }
 0x13a   : > { %v499_v23 = vsel %vm2341_vm5, %v2426_v32, %v2443_v47  ;;  %v500_v28 = vsel %vm2337_vm4, %v2431_v33, %v2437_v55  ;;  %v451_v37 = vmul.f32 %v446_v30, %v2321_v22  ;;  %v452_v57 = vmul.f32 %v450_v3, %v2321_v22 }
 0x13b   : > { %v419_v11 = vadd.f32 %v417_v53, %v403_v31  ;;  %v420_v0 = vadd.f32 %v418_v45, %v404_v27  ;;  %v467_v16 = vmul.f32 %v462_v49, %v2311_v61  ;;  %v468_v18 = vmul.f32 %v466_v59, %v2311_v61 }
 0x13c   : > { %v574_v62 = vrot.slane %v2161_v2, %v2346_v1  ;;  %v603_v38 = vsub.s32 5, %v2334_v48  ;;  %v510_v41 = vrot.slane %v499_v23, %v2346_v1  ;;  %v514_v56 = vrot.slane %v500_v28, %v2346_v1 }
 0x13d   : > { %v437_v34 = vadd.f32 %v435_v25, %v419_v11  ;;  %v438_v12 = vadd.f32 %v436_v58, %v420_v0  ;;  %v569_v51 = vpop.permute.xlu1 %568  ;;  %v483_v50 = vmul.f32 %v478_v10, %v2315_v63  ;;  %v484_v22 = vmul.f32 %v482_v13, %v2315_v63 }
 0x13e   : > { %v629_v52 = vsub.s32 6, %v2334_v48  ;;  %v526_v61 = vrot.slane %v499_v23, %v2349_v60  ;;  %v530_v30 = vrot.slane %v500_v28, %v2349_v60  ;;  %v578_v3 = vrot.slane %v2161_v2, %v577_v20 }
 0x13f   : > { %v453_v54 = vadd.f32 %v451_v37, %v437_v34  ;;  %v454_v29 = vadd.f32 %v452_v57, %v438_v12  ;;  %v584_v31 = vrot.slane %v574_v62, %v2346_v1  ;;  %v600_v27 = vrot.slane %v2161_v2, %v2349_v60  ;;  %v553_v62 = vpop.permute.xlu0 %552 }
 0x140   : > { %v604_v49 = vrot.slane %v2161_v2, %v603_v38  ;;  %v515_v63 = vmul.f32 %v510_v41, %v2325_v24  ;;  %v516_v11 = vmul.f32 %v514_v56, %v2325_v24  ;;  %v542_v58 = vrot.slane %v499_v23, %v2361_v43 }
 0x141   : > { %v469_v53 = vadd.f32 %v467_v16, %v453_v54  ;;  %v470_v45 = vadd.f32 %v468_v18, %v454_v29  ;;  %v546_v10 = vrot.slane %v500_v28, %v2361_v43  ;;  %v630_v20 = vrot.slane %v2161_v2, %v629_v52 }
 0x142   : > { %v595_v59 = vpop.permute.xlu1 %594  ;;  %v655_v13 = vsub.s32 7, %v2334_v48  ;;  %v531_v37 = vmul.f32 %v526_v61, %v2319_v4  ;;  %v532_v57 = vmul.f32 %v530_v30, %v2319_v4  ;;  %v547_v16 = vmul.f32 %v542_v58, %v537_v15 }
 0x143   : > { %v485_v0 = vadd.f32 %v483_v50, %v469_v53  ;;  %v486_v25 = vadd.f32 %v484_v22, %v470_v45  ;;  %v548_v18 = vmul.f32 %v546_v10, %v537_v15  ;;  %v588_v24 = vrot.slane %v578_v3, %v2346_v1 }
 0x144   : > { %v626_v38 = vrot.slane %v2161_v2, %v2361_v43  ;;  %v558_v41 = vrot.slane %v499_v23, %v2364_v36  ;;  %v562_v48 = vrot.slane %v500_v28, %v2364_v36  ;;  %v610_v50 = vrot.slane %v600_v27, %v2349_v60  ;;  %v621_v28 = vpop.permute.xlu0 %620 }
 0x145   : > { %v517_v34 = vadd.f32 %v515_v63, %v485_v0  ;;  %v518_v12 = vadd.f32 %v516_v11, %v486_v25  ;;  %v614_v22 = vrot.slane %v604_v49, %v2349_v60  ;;  %v640_v4 = vrot.slane %v630_v20, %v2361_v43 }
 0x146   : > { %v656_v15 = vrot.slane %v2161_v2, %v655_v13  ;;  %v563_v45 = vmul.f32 %v558_v41, %v553_v62  ;;  %v564_v61 = vmul.f32 %v562_v48, %v553_v62  ;;  %v636_v30 = vrot.slane %v626_v38, %v2361_v43 }
 0x147   : > { %v533_v54 = vadd.f32 %v531_v37, %v517_v34  ;;  %v534_v29 = vadd.f32 %v532_v57, %v518_v12  ;;  %v647_v56 = vpop.permute.xlu1 %646  ;;  %v589_v3 = vmul.f32 %v584_v31, %v569_v51  ;;  %v590_v63 = vmul.f32 %v588_v24, %v569_v51 }
 0x148   : > { %v615_v0 = vmul.f32 %v610_v50, %v595_v59  ;;  %v652_v27 = vrot.slane %v2161_v2, %v2364_v36  ;;  %v666_v49 = vrot.slane %v656_v15, %v2364_v36  ;;  %v616_v20 = vmul.f32 %v614_v22, %v595_v59 }
 0x149   : > { %v549_v52 = vadd.f32 %v547_v16, %v533_v54  ;;  %v550_v53 = vadd.f32 %v548_v18, %v534_v29  ;;  %v642_v13 = vmul.f32 %v640_v4, %v621_v28  ;;  %v641_v37 = vmul.f32 %v636_v30, %v621_v28  ;;  %v691_v16 = vpop.permute.xlu0 %690 }
 0x14a   : > { %v662_v51 = vrot.slane %v652_v27, %v2364_v36  ;;  %v668_v31 = vmul.f32 %v666_v49, %v647_v56  ;;  %v671_v2 = vsel %vm2386_vm7, %v2443_v47, %v2426_v32  ;;  %v672_v59 = vsel %vm2390_vm8, %v2437_v55, %v2431_v33 }
 0x14b   : > { %v565_v23 = vadd.f32 %v563_v45, %v549_v52  ;;  %v566_v11 = vadd.f32 %v564_v61, %v550_v53  ;;  %v680_v41 = vrot.slane %v671_v2, %v2346_v1  ;;  %v684_v48 = vrot.slane %v672_v59, %v2346_v1 }
 0x14c   : > { %v675_v25 = vpop.permute.xlu1 %674  ;;  %v667_v38 = vmul.f32 %v662_v51, %v647_v56  ;;  %v696_v15 = vrot.slane %v671_v2, %v2349_v60  ;;  %v700_v52 = vrot.slane %v672_v59, %v2349_v60  ;;  %v712_v30 = vrot.slane %v671_v2, %v2361_v43 }
 0x14d   : > { %v591_v58 = vadd.f32 %v589_v3, %v565_v23  ;;  %v592_v10 = vadd.f32 %v590_v63, %v566_v11  ;;  %v753_v50 = vpop.permute.xlu0 %752  ;;  %v685_v22 = vmul.f32 %v680_v41, %v675_v25  ;;  %v686_v4 = vmul.f32 %v684_v48, %v675_v25 }
 0x14e   : > { %v701_v45 = vmul.f32 %v696_v15, %v691_v16  ;;  %v702_v61 = vmul.f32 %v700_v52, %v691_v16  ;;  %v716_v3 = vrot.slane %v672_v59, %v2361_v43  ;;  %v728_v49 = vrot.slane %v671_v2, %v2364_v36 }
 0x14f   : > { %v617_v34 = vadd.f32 %v615_v0, %v591_v58  ;;  %v618_v12 = vadd.f32 %v616_v20, %v592_v10  ;;  %v732_v25 = vrot.slane %v672_v59, %v2364_v36 }
 0x151   : > { %v644_v57 = vadd.f32 %v642_v13, %v618_v12  ;;  %v707_v18 = vpop.permute.xlu1 %706  ;;  %v643_v24 = vadd.f32 %v641_v37, %v617_v34  ;;  %v740_v33 = vpop.permute.xlu0 %739 }
 0x152   : > { %v717_v23 = vmul.f32 %v712_v30, %v707_v18  ;;  %v718_v11 = vmul.f32 %v716_v3, %v707_v18  ;;  %v826_v30 = vrot.slane %v2260_v39, %v2346_v1 }
 0x153   : > { %v670_v62 = vadd.f32 %v668_v31, %v644_v57  ;;  %v669_v29 = vadd.f32 %v667_v38, %v643_v24 }
 0x155   : > { %v687_v32 = vadd.f32 %v685_v22, %v669_v29  ;;  %v688_v47 = vadd.f32 %v686_v4, %v670_v62  ;;  %v746_v27 = vpop.permute.xlu0 %745 }
 0x156   : > { %v723_v54 = vpop.permute.xlu1 %722 }
 0x157   : > { %v703_v55 = vadd.f32 %v701_v45, %v687_v32  ;;  %v704_v56 = vadd.f32 %v702_v61, %v688_v47  ;;  %v733_v12 = vmul.f32 %v728_v49, %v723_v54  ;;  %v734_v37 = vmul.f32 %v732_v25, %v723_v54 }
 0x159   : > { %v719_v28 = vadd.f32 %v717_v23, %v703_v55  ;;  %v720_v0 = vadd.f32 %v718_v11, %v704_v56  ;;  %v801_v47 = vpop.permute.xlu0 %800 }
 0x15b   : > { %v769_v53 = vpop.permute.xlu1 %768  ;;  %v735_v62 = vadd.f32 %v733_v12, %v719_v28  ;;  %v736_v2 = vadd.f32 %v734_v37, %v720_v0  ;;  %v838_v28 = vrot.slane %v2212_v26, %v2349_v60  ;;  %v858_v12 = vrot.slane %v2260_v39, %v2361_v43 }
 0x15d   : > { %v849_v37 = vpop.permute.xlu0 %848 }
 0x15f   : > { %v738_v63 = vpop.permute.xlu1 %737 }
 0x160   : > { %v741_v10 = vsel %vm279_vm6, %v738_v63, %v740_v33  ;;  %v742_v20 = vsel %vm279_vm6, %v740_v33, %v738_v63 }
 0x163   : > { %v744_v58 = vpop.permute.xlu1 %743 }
 0x164   : > { %v747_v13 = vsel %vm286_vm3, %v744_v58, %v746_v27  ;;  %v748_v34 = vsel %vm286_vm3, %v746_v27, %v744_v58  ;;  %v854_v58 = vrot.slane %v2212_v26, %v2361_v43 }
 0x165   : > { %v749_v57 = vsel %vm2341_vm5, %v747_v13, %v742_v20  ;;  %v750_v51 = vsel %vm2337_vm4, %v748_v34, %v741_v10 }
 0x166   : > { %v758_v31 = vrot.slane %v749_v57, %v2346_v1  ;;  %v762_v16 = vrot.slane %v750_v51, %v2346_v1  ;;  %v774_v18 = vrot.slane %v749_v57, %v2349_v60  ;;  %v778_v24 = vrot.slane %v750_v51, %v2349_v60 }
 0x167   : > { %v785_v59 = vpop.permute.xlu1 %784  ;;  %v790_v54 = vrot.slane %v749_v57, %v2361_v43  ;;  %v794_v41 = vrot.slane %v750_v51, %v2361_v43  ;;  %v806_v48 = vrot.slane %v749_v57, %v2364_v36  ;;  %v810_v22 = vrot.slane %v750_v51, %v2364_v36 }
 0x168   : > { %v763_v38 = vmul.f32 %v758_v31, %v753_v50  ;;  %v764_v29 = vmul.f32 %v762_v16, %v753_v50  ;;  %v779_v52 = vmul.f32 %v774_v18, %v769_v53  ;;  %v780_v32 = vmul.f32 %v778_v24, %v769_v53 }
 0x169   : > { %v795_v33 = vmul.f32 %v790_v54, %v785_v59  ;;  %v796_v55 = vmul.f32 %v794_v41, %v785_v59  ;;  %v822_v50 = vrot.slane %v2212_v26, %v2346_v1  ;;  %v811_v23 = vmul.f32 %v806_v48, %v801_v47 }
 0x16a   : > { %v765_v4 = vadd.f32 %v763_v38, %v735_v62  ;;  %v766_v15 = vadd.f32 %v764_v29, %v736_v2  ;;  %v812_v11 = vmul.f32 %v810_v22, %v801_v47  ;;  %v842_v53 = vrot.slane %v2260_v39, %v2349_v60 }
 0x16b   : > { %v859_v24 = vmul.f32 %v854_v58, %v849_v37  ;;  %v860_v62 = vmul.f32 %v858_v12, %v849_v37  ;;  %v870_v38 = vrot.slane %v2212_v26, %v2364_v36  ;;  %v874_v29 = vrot.slane %v2260_v39, %v2364_v36 }
 0x16c   : > { %v781_v45 = vadd.f32 %v779_v52, %v765_v4  ;;  %v782_v61 = vadd.f32 %v780_v32, %v766_v15  ;;  %v817_v56 = vpop.permute.xlu1 %816  ;;  %v879_v22 = vsel %vm2386_vm7, %v742_v20, %v747_v13  ;;  %v880_v4 = vsel %vm2390_vm8, %v741_v10, %v748_v34 }
 0x16d   : > { %v827_v49 = vmul.f32 %v822_v50, %v817_v56  ;;  %v828_v25 = vmul.f32 %v826_v30, %v817_v56  ;;  %v892_v26 = vrot.slane %v880_v4, %v2346_v1  ;;  %v904_v39 = vrot.slane %v879_v22, %v2349_v60  ;;  %v899_v50 = vpop.permute.xlu0 %898 }
 0x16e   : > { %v797_v3 = vadd.f32 %v795_v33, %v781_v45  ;;  %v798_v63 = vadd.f32 %v796_v55, %v782_v61  ;;  %v888_v45 = vrot.slane %v879_v22, %v2346_v1  ;;  %v908_v33 = vrot.slane %v880_v4, %v2349_v60 }
 0x16f   : > { %v909_v30 = vmul.f32 %v904_v39, %v899_v50  ;;  %v3021_v39 = vmov 24  }
 0x170   : > { %v813_v0 = vadd.f32 %v811_v23, %v797_v3  ;;  %v814_v27 = vadd.f32 %v812_v11, %v798_v63  ;;  %v910_v10 = vmul.f32 %v908_v33, %v899_v50  ;;  %v920_v3 = vrot.slane %v879_v22, %v2361_v43 }
 0x171   : > { %v833_v57 = vpop.permute.xlu1 %832  ;;  %v924_v63 = vrot.slane %v880_v4, %v2361_v43  ;;  %v3022_v33 = vmov 25  }
 0x172   : > { %v829_v51 = vadd.f32 %v827_v49, %v813_v0  ;;  %v830_v31 = vadd.f32 %v828_v25, %v814_v27  ;;  %v843_v16 = vmul.f32 %v838_v28, %v833_v57  ;;  %v844_v18 = vmul.f32 %v842_v53, %v833_v57  ;;  %v949_v57 = vpop.permute.xlu0 %948 }
 0x173   : > { %v936_v0 = vrot.slane %v879_v22, %v2364_v36  ;;  %v940_v27 = vrot.slane %v880_v4, %v2364_v36  ;;  %v3012_v22 = vmov 16   ;;  %v3013_v4 = vmov 18  }
 0x174   : > { %v845_v2 = vadd.f32 %v843_v16, %v829_v51  ;;  %v846_v59 = vadd.f32 %v844_v18, %v830_v31 }
 0x176   : > { %v865_v54 = vpop.permute.xlu1 %864  ;;  %v861_v41 = vadd.f32 %v859_v24, %v845_v2  ;;  %v862_v48 = vadd.f32 %v860_v62, %v846_v59  ;;  %v2573_v62 = vld [vmem:[%s2959_s3] sm:$0xf] }
 0x177   : > { %v875_v15 = vmul.f32 %v870_v38, %v865_v54  ;;  %v876_v52 = vmul.f32 %v874_v29, %v865_v54 }
 0x179   : > { %v877_v32 = vadd.f32 %v875_v15, %v861_v41  ;;  %v878_v47 = vadd.f32 %v876_v52, %v862_v48  ;;  %v3014_v15 = vmov 17   ;;  %v3015_v52 = vmov 19  }
 0x17b   : > { %v883_v61 = vpop.permute.xlu1 %882 }
 0x17c   : > { %v893_v55 = vmul.f32 %v888_v45, %v883_v61  ;;  %v894_v56 = vmul.f32 %v892_v26, %v883_v61  ;;  %v3018_v45 = vmov 23   ;;  %v3019_v26 = vmov 22  }
 0x17d   : > { %v3020_v61 = vmov 26  }
 0x17e   : > { %v895_v20 = vadd.f32 %v893_v55, %v877_v32  ;;  %v896_v13 = vadd.f32 %v894_v56, %v878_v47  ;;  %v3016_v32 = vmov 20   ;;  %v3017_v47 = vmov 21  }
 0x17f   : > { %v3023_v55 = vmov 29   ;;  %v3024_v56 = vmov 27  }
 0x180   : > { %v915_v34 = vpop.permute.xlu1 %914  ;;  %v911_v23 = vadd.f32 %v909_v30, %v895_v20  ;;  %v912_v11 = vadd.f32 %v910_v10, %v896_v13  ;;  %v3025_v20 = vmov 32   ;;  %v3026_v30 = vmov 28  }
 0x181   : > { %v925_v28 = vmul.f32 %v920_v3, %v915_v34  ;;  %v926_v53 = vmul.f32 %v924_v63, %v915_v34  ;;  %v3027_v10 = vmov 35   ;;  %v3028_v3 = vmov 0  }
 0x182   : > { %v3029_v63 = vmov 30  }
 0x183   : > { %v927_v25 = vadd.f32 %v925_v28, %v911_v23  ;;  %v928_v58 = vadd.f32 %v926_v53, %v912_v11  ;;  %v3030_v11 = vmov 31   ;;  %v3031_v53 = vmov 33  }
 0x185   : > { %v931_v49 = vpop.permute.xlu1 %930 }
 0x186   : > { %v941_v12 = vmul.f32 %v936_v0, %v931_v49  ;;  %v942_v37 = vmul.f32 %v940_v27, %v931_v49  ;;  %v3032_v27 = vmov 34   ;;  %v1597_v49 = vld [vmem:[%s2960_s4] sm:$0xf] }
 0x188   : > { %v943_v51 = vadd.f32 %v941_v12, %v927_v25  ;;  %v944_v31 = vadd.f32 %v942_v37, %v928_v58 }
 0x18a   : > { %v951_v16 = vadd.f32 %v949_v57, %v943_v51  ;;  %v952_v18 = vadd.f32 %v949_v57, %v944_v31 }
 0x18c   : > { %v2564_v24 = vmax.f32 %v951_v16, 0.0  ;;  %v2575_v2 = vmax.f32 %v952_v18, 0.0 }
 0x18e   : > { %961 = vrot.lane.b32.xlu0 %v2564_v24, %s1975_s12  ;;  %955 = vrot.lane.b32.xlu1 %v2564_v24, %s1976_s14 }
 0x192   : > { %988 = vperm.xlu0 %1835, %v2573_v62   ;;  %957 = vrot.lane.b32.xlu1 %v2575_v2, %s1976_s14  ;;  %s240_s14 = scalar_lea.vmem [#allocation5], %s1704_s17 }
 0x193   : > { %s1627_s29 = sshll.u32 %s240_s14, 4  ;;  %s2914_s29 = int_to_ptr.vmem [resolvable:$true] %s1627_s29 }
 0x196   : > { %1837 = vset.pattern.permute.xlu0 %v1977_v5  ;;  %963 = vrot.lane.b32.xlu1 %v2575_v2, %s1975_s12  ;;  %v3006_v5 = vmov 7   ;;  %s1712_s12 = sshll.u32 %s2065_s22, 7  ;;  %s2013_s22 = smov [#allocation5]  }
 0x197   : > { %1020 = vperm.xlu0 %1837, %v2573_v62   ;;  %s2912_s26 = scalar_lea.hbm %s2961_s5, %s1712_s12  ;;  %s1908_s17 = sshll.u32 %s2013_s22, 4  ;;  %s1909_s17 = int_to_ptr.vmem [resolvable:$false] %s1908_s17 }
 0x198   : > { %s1910_s7 = scalar_lea.vmem %s1909_s17, 256  ;;  %p1911_p7 = scmp.lt.s32.totalorder %s2914_s29, %s1909_s17 }
 0x19a   : > { %1004 = vperm.xlu1 %1836, %v2573_v62  }
 0x19b   : > { %1840 = vset.pattern.permute.xlu0 %v1981_v9  ;;  %v3010_v9 = vmov 13  }
 0x19c   : > { %1068 = vperm.xlu0 %1840, %v2573_v62  }
 0x19e   : > { %1838 = vset.pattern.permute.xlu1 %v1978_v6  ;;  %v3007_v6 = vmov 9  }
 0x19f   : > { %1036 = vperm.xlu1 %1838, %v2573_v62  }
 0x1a0   : > { %1843 = vset.pattern.permute.xlu0 %v1985_v14  ;;  %v3011_v14 = vmov 15  }
 0x1a1   : > { %1118 = vperm.xlu0 %1843, %v2573_v62  }
 0x1a3   : > { %1839 = vset.pattern.permute.xlu1 %v1979_v7  ;;  %v3008_v7 = vmov 10  }
 0x1a4   : > { %1052 = vperm.xlu1 %1839, %v2573_v62  }
 0x1a5   : > { %1846 = vset.pattern.permute.xlu0 %v1989_v17 }
 0x1a6   : > { %1166 = vperm.xlu0 %1846, %v2573_v62  }
 0x1a8   : > { %1841 = vset.pattern.permute.xlu1 %v1980_v8  ;;  %v3009_v8 = vmov 12  }
 0x1a9   : > { %1084 = vperm.xlu1 %1841, %v2573_v62  }
 0x1aa   : > { %1181 = vrot.lane.b32.xlu0 %v2564_v24, %s1986_s28 }
 0x1ab   : > { %1849 = vset.pattern.permute.xlu0 %v1991_v19 }
 0x1ad   : > { %1842 = vset.pattern.permute.xlu1 %v3006_v5 }
 0x1ae   : > { %1187 = vrot.lane.b32.xlu0 %v2564_v24, %s1992_s8  ;;  %1100 = vperm.xlu1 %1842, %v2573_v62  }
 0x1b2   : > { %1844 = vset.pattern.permute.xlu1 %v3007_v6 }
 0x1b3   : > { %1134 = vperm.xlu1 %1844, %v2573_v62  }
 0x1b7   : > { %1845 = vset.pattern.permute.xlu1 %v3008_v7 }
 0x1b8   : > { %1150 = vperm.xlu1 %1845, %v2573_v62  }
 0x1bc   : > { %1847 = vset.pattern.permute.xlu1 %v3009_v8 }
 0x1bd   : > { %1196 = vperm.xlu1 %1847, %v2573_v62  }
 0x1c1   : > { %1848 = vset.pattern.permute.xlu1 %v3010_v9 }
 0x1c2   : > { %1212 = vperm.xlu1 %1848, %v2573_v62  }
 0x1c6   : > { %1183 = vrot.lane.b32.xlu1 %v2575_v2, %s1986_s28 }
 0x1c7   : > { %1850 = vset.pattern.permute.xlu1 %v3011_v14 }
 0x1ca   : > { %1189 = vrot.lane.b32.xlu1 %v2575_v2, %s1992_s8 }
 0x200   : > { %v956_v17 = vpop.permute.xlu1 %955  ;;  %v962_v38 = vpop.permute.xlu0 %961 }
 0x204   : > { %v958_v19 = vpop.permute.xlu1 %957 }
 0x205   : > { %v2619_v59 = vsel %vm245_vm1, %v956_v17, %v958_v19  ;;  %v960_v54 = vsel %vm245_vm1, %v958_v19, %v956_v17 }
 0x206   : > { %973 = vrot.lane.b32.xlu1 %v2619_v59, %s1986_s28 }
 0x208   : > { %v964_v29 = vpop.permute.xlu1 %963 }
 0x209   : > { %v2627_v41 = vsel %vm268_vm0, %v962_v38, %v964_v29  ;;  %v966_v50 = vsel %vm268_vm0, %v964_v29, %v962_v38 }
 0x20a   : > { %979 = vrot.lane.b32.xlu1 %v2619_v59, %s1992_s8  ;;  %v2634_v48 = vsel %vm245_vm1, %v2627_v41, %v960_v54  ;;  %v2679_v13 = vsel %vm248_vm2, %v2619_v59, %v966_v50 }
 0x20b   : > { %971 = vrot.lane.b32.xlu0 %v2634_v48, %s1986_s28 }
 0x20e   : > { %1244 = vperm.xlu1 %1850, %v2573_v62  }
 0x20f   : > { %977 = vrot.lane.b32.xlu0 %v2634_v48, %s1992_s8 }
 0x211   : > { %v989_v25 = vpop.permute.xlu0 %988 }
 0x212   : > { %1851 = vset.pattern.permute.xlu1 %v3012_v22 }
 0x213   : > { %1260 = vperm.xlu1 %1851, %v2573_v62   ;;  %1228 = vperm.xlu0 %1849, %v2573_v62  }
 0x216   : > { %v1021_v12 = vpop.permute.xlu0 %1020 }
 0x217   : > { %1853 = vset.pattern.permute.xlu1 %v3013_v4  ;;  %1852 = vset.pattern.permute.xlu0 %v3014_v15 }
 0x218   : > { %1292 = vperm.xlu1 %1853, %v2573_v62   ;;  %1276 = vperm.xlu0 %1852, %v2573_v62  }
 0x219   : > { %v1005_v34 = vpop.permute.xlu1 %1004 }
 0x21b   : > { %v1069_v57 = vpop.permute.xlu0 %1068 }
 0x21c   : > { %1854 = vset.pattern.permute.xlu1 %v3015_v52  ;;  %1855 = vset.pattern.permute.xlu0 %v3016_v32 }
 0x21d   : > { %1308 = vperm.xlu1 %1854, %v2573_v62   ;;  %1326 = vperm.xlu0 %1855, %v2573_v62  }
 0x21e   : > { %v1037_v35 = vpop.permute.xlu1 %1036 }
 0x220   : > { %v2712_v31 = vpop.permute.xlu0 %1118 }
 0x221   : > { %1856 = vset.pattern.permute.xlu1 %v3017_v47  ;;  %1858 = vset.pattern.permute.xlu0 %v3018_v45 }
 0x222   : > { %1342 = vperm.xlu1 %1856, %v2573_v62   ;;  %1374 = vperm.xlu0 %1858, %v2573_v62  }
 0x223   : > { %v1053_v23 = vpop.permute.xlu1 %1052 }
 0x225   : > { %v2716_v18 = vpop.permute.xlu0 %1166 }
 0x226   : > { %1857 = vset.pattern.permute.xlu1 %v3019_v26  ;;  %1389 = vrot.lane.b32.xlu0 %v2627_v41, %s1986_s28 }
 0x227   : > { %1358 = vperm.xlu1 %1857, %v2573_v62   ;;  %1861 = vset.pattern.permute.xlu0 %v3020_v61 }
 0x228   : > { %v2694_v28 = vpop.permute.xlu1 %1084 }
 0x229   : > { %v2720_v5 = vpop.permute.xlu0 %1181 }
 0x22a   : > { %1395 = vrot.lane.b32.xlu0 %v2627_v41, %s1992_s8 }
 0x22b   : > { %1859 = vset.pattern.permute.xlu1 %v3021_v39 }
 0x22c   : > { %1404 = vperm.xlu1 %1859, %v2573_v62  }
 0x22d   : > { %v2698_v0 = vpop.permute.xlu1 %1100  ;;  %v1188_v7 = vpop.permute.xlu0 %1187 }
 0x22e   : > { %1436 = vperm.xlu0 %1861, %v2573_v62  }
 0x230   : > { %1860 = vset.pattern.permute.xlu1 %v3022_v33 }
 0x231   : > { %1420 = vperm.xlu1 %1860, %v2573_v62  }
 0x232   : > { %1864 = vset.pattern.permute.xlu0 %v3023_v55  ;;  %v2705_v58 = vpop.permute.xlu1 %1134 }
 0x233   : > { %1484 = vperm.xlu0 %1864, %v2573_v62  }
 0x235   : > { %1862 = vset.pattern.permute.xlu1 %v3024_v56 }
 0x236   : > { %1452 = vperm.xlu1 %1862, %v2573_v62  }
 0x237   : > { %1867 = vset.pattern.permute.xlu0 %v3025_v20  ;;  %v2708_v37 = vpop.permute.xlu1 %1150 }
 0x238   : > { %1534 = vperm.xlu0 %1867, %v2573_v62  }
 0x23a   : > { %1391 = vrot.lane.b32.xlu1 %v2679_v13, %s1986_s28  ;;  %s1613_s28 = scalar_lea.sflag [#allocation4], %s2149_s13 }
 0x23b   : > { %1863 = vset.pattern.permute.xlu1 %v3026_v30 }
 0x23c   : > { %1870 = vset.pattern.permute.xlu0 %v3027_v10  ;;  %v2710_v51 = vpop.permute.xlu1 %1196 }
 0x23d   : > { %1582 = vperm.xlu0 %1870, %v2573_v62  }
 0x23e   : > { %1397 = vrot.lane.b32.xlu1 %v2679_v13, %s1992_s8  ;;  %s1904_s8 = scalar_lea.vmem %s2914_s29, 128 }
 0x23f   : > { %p1905_p6 = scmp.ne.s32.totalorder %s2914_s29, %s1904_s8  ;;  %p1912_p10 = scmp.lt.s32.totalorder %s1910_s7, %s1904_s8 }
 0x241   : > { %1872 = vset.pattern.permute.xlu0 %v3028_v3  ;;  %v2714_v16 = vpop.permute.xlu1 %1212  ;;  %p1906_p12 = pnand %p1905_p6, %p3033_p11  ;;  %p1913_p2 = por %p1912_p10, %p1911_p7 }
 0x242   : > { %1468 = vperm.xlu1 %1863, %v2573_v62  }
 0x243   : > { %p1907_p13 = pneg %p1906_p12 }
 0x245   : > { %p1914_p4 = pnand %p1913_p2, %p1907_p13 }
 0x246   : > { %1865 = vset.pattern.permute.xlu1 %v3029_v63  ;;  %v1058_v63 = vrot.slane %v2634_v48, %v2346_v1 }
 0x247   : > { %1500 = vperm.xlu1 %1865, %v2573_v62  }
 0x24b   : > { %1866 = vset.pattern.permute.xlu1 %v3030_v11  ;;  %v1062_v11 = vrot.slane %v2619_v59, %v2346_v1 }
 0x24c   : > { %1516 = vperm.xlu1 %1866, %v2573_v62  }
 0x250   : > { %1868 = vset.pattern.permute.xlu1 %v3031_v53 }
 0x251   : > { %1550 = vperm.xlu1 %1868, %v2573_v62  }
 0x255   : > { %1869 = vset.pattern.permute.xlu1 %v3032_v27 }
 0x256   : > { %1566 = vperm.xlu1 %1869, %v2573_v62   ;;  %v2718_v62 = vpop.permute.xlu1 %1183 }
 0x25a   : > { %1871 = vset.pattern.permute.xlu1 %v3028_v3  ;;  %v1190_v6 = vpop.permute.xlu1 %1189 }
 0x25b   : > { %1600 = vperm.xlu1 %1871, %v1597_v49  }
 0x278   : > { %v974_v8 = vpop.permute.xlu1 %973 }
 0x27c   : > { %v980_v14 = vpop.permute.xlu1 %979 }
 0x27d   : > { %v972_v9 = vpop.permute.xlu0 %971 }
 0x27e   : > { %v975_v19 = vsel %vm279_vm6, %v972_v9, %v974_v8  ;;  %v976_v38 = vsel %vm279_vm6, %v974_v8, %v972_v9  ;;  %v1074_v9 = vrot.slane %v2634_v48, %v2349_v60 }
 0x281   : > { %v978_v17 = vpop.permute.xlu0 %977 }
 0x282   : > { %v981_v29 = vsel %vm286_vm3, %v978_v17, %v980_v14  ;;  %v982_v54 = vsel %vm286_vm3, %v980_v14, %v978_v17  ;;  %v1063_v14 = vmul.f32 %v1058_v63, %v1053_v23  ;;  %v1064_v17 = vmul.f32 %v1062_v11, %v1053_v23 }
 0x283   : > { %v983_v22 = vsel %vm2341_vm5, %v981_v29, %v976_v38  ;;  %v984_v4 = vsel %vm2337_vm4, %v982_v54, %v975_v19 }
 0x284   : > { %v994_v15 = vrot.slane %v983_v22, %v2346_v1  ;;  %v998_v52 = vrot.slane %v984_v4, %v2346_v1  ;;  %v1010_v32 = vrot.slane %v983_v22, %v2349_v60  ;;  %v1014_v47 = vrot.slane %v984_v4, %v2349_v60 }
 0x285   : > { %v1026_v45 = vrot.slane %v983_v22, %v2361_v43  ;;  %v1030_v26 = vrot.slane %v984_v4, %v2361_v43  ;;  %v1042_v61 = vrot.slane %v983_v22, %v2364_v36  ;;  %v1046_v39 = vrot.slane %v984_v4, %v2364_v36 }
 0x286   : > { %v999_v33 = vmul.f32 %v994_v15, %v989_v25  ;;  %v1000_v55 = vmul.f32 %v998_v52, %v989_v25  ;;  %v1015_v56 = vmul.f32 %v1010_v32, %v1005_v34  ;;  %v1016_v50 = vmul.f32 %v1014_v47, %v1005_v34 }
 0x287   : > { %v1031_v10 = vmul.f32 %v1026_v45, %v1021_v12  ;;  %v1032_v3 = vmul.f32 %v1030_v26, %v1021_v12  ;;  %v1047_v49 = vmul.f32 %v1042_v61, %v1037_v35  ;;  %v1048_v8 = vmul.f32 %v1046_v39, %v1037_v35 }
 0x288   : > { %v1017_v20 = vadd.f32 %v1015_v56, %v999_v33  ;;  %v1018_v30 = vadd.f32 %v1016_v50, %v1000_v55  ;;  %v1078_v34 = vrot.slane %v2619_v59, %v2349_v60  ;;  %v1094_v25 = vrot.slane %v2619_v59, %v2361_v43 }
 0x289   : > { %v1110_v12 = vrot.slane %v2619_v59, %v2364_v36  ;;  %v1090_v15 = vrot.slane %v2634_v48, %v2361_v43  ;;  %v1106_v35 = vrot.slane %v2634_v48, %v2364_v36  ;;  %v1115_v52 = vsel %vm2386_vm7, %v976_v38, %v981_v29 }
 0x28a   : > { %v1033_v53 = vadd.f32 %v1031_v10, %v1017_v20  ;;  %v1034_v27 = vadd.f32 %v1032_v3, %v1018_v30  ;;  %v1116_v32 = vsel %vm2390_vm8, %v975_v19, %v982_v54  ;;  %v1079_v45 = vmul.f32 %v1074_v9, %v1069_v57 }
 0x28b   : > { %v1080_v59 = vmul.f32 %v1078_v34, %v1069_v57  ;;  %v1095_v61 = vmul.f32 %v1090_v15, %v2694_v28  ;;  %v1096_v39 = vmul.f32 %v1094_v25, %v2694_v28  ;;  %v2768_v33 = vsel %vm286_vm3, %v1188_v7, %v1190_v6 }
 0x28c   : > { %v1049_v22 = vadd.f32 %v1047_v49, %v1033_v53  ;;  %v1050_v4 = vadd.f32 %v1048_v8, %v1034_v27  ;;  %v2772_v48 = vsel %vm286_vm3, %v1190_v6, %v1188_v7  ;;  %v1124_v29 = vrot.slane %v1115_v52, %v2346_v1 }
 0x28d   : > { %v2762_v47 = vpop.permute.xlu1 %1244  ;;  %v1128_v57 = vrot.slane %v1116_v32, %v2346_v1  ;;  %v1111_v54 = vmul.f32 %v1106_v35, %v2698_v0  ;;  %v1112_v55 = vmul.f32 %v1110_v12, %v2698_v0  ;;  %v1140_v28 = vrot.slane %v1115_v52, %v2349_v60 }
 0x28e   : > { %v1065_v26 = vadd.f32 %v1063_v14, %v1049_v22  ;;  %v1066_v23 = vadd.f32 %v1064_v17, %v1050_v4  ;;  %v1144_v56 = vrot.slane %v1116_v32, %v2349_v60  ;;  %v2784_v6 = vsel %vm279_vm6, %v2720_v5, %v2718_v62 }
 0x28f   : > { %v2790_v7 = vsel %vm279_vm6, %v2718_v62, %v2720_v5  ;;  %v1194_v10 = vsel %vm2337_vm4, %v2772_v48, %v2784_v6  ;;  %v1156_v3 = vrot.slane %v1115_v52, %v2361_v43  ;;  %v1160_v63 = vrot.slane %v1116_v32, %v2361_v43 }
 0x290   : > { %v1081_v38 = vadd.f32 %v1079_v45, %v1065_v26  ;;  %v1082_v19 = vadd.f32 %v1080_v59, %v1066_v23  ;;  %v1193_v0 = vsel %vm2341_vm5, %v2768_v33, %v2790_v7  ;;  %v1129_v5 = vmul.f32 %v1124_v29, %v2712_v31 }
 0x291   : > { %v1130_v53 = vmul.f32 %v1128_v57, %v2712_v31  ;;  %v1145_v27 = vmul.f32 %v1140_v28, %v2705_v58  ;;  %v1146_v49 = vmul.f32 %v1144_v56, %v2705_v58  ;;  %v1172_v34 = vrot.slane %v1115_v52, %v2364_v36 }
 0x292   : > { %v1097_v50 = vadd.f32 %v1095_v61, %v1081_v38  ;;  %v1098_v20 = vadd.f32 %v1096_v39, %v1082_v19  ;;  %v1261_v30 = vpop.permute.xlu1 %1260  ;;  %v1176_v25 = vrot.slane %v1116_v32, %v2364_v36  ;;  %v1202_v12 = vrot.slane %v1193_v0, %v2346_v1  ;;  %v1229_v19 = vpop.permute.xlu0 %1228 }
 0x293   : > { %v1206_v14 = vrot.slane %v1194_v10, %v2346_v1  ;;  %v1161_v15 = vmul.f32 %v1156_v3, %v2708_v37  ;;  %v1162_v31 = vmul.f32 %v1160_v63, %v2708_v37  ;;  %v1218_v35 = vrot.slane %v1193_v0, %v2349_v60 }
 0x294   : > { %v1113_v11 = vadd.f32 %v1111_v54, %v1097_v50  ;;  %v1114_v62 = vadd.f32 %v1112_v55, %v1098_v20  ;;  %v1222_v58 = vrot.slane %v1194_v10, %v2349_v60  ;;  %v1177_v45 = vmul.f32 %v1172_v34, %v2716_v18 }
 0x295   : > { %v1178_v52 = vmul.f32 %v1176_v25, %v2716_v18  ;;  %v1207_v61 = vmul.f32 %v1202_v12, %v2710_v51  ;;  %v1208_v39 = vmul.f32 %v1206_v14, %v2710_v51  ;;  %v1234_v37 = vrot.slane %v1193_v0, %v2361_v43 }
 0x296   : > { %v1131_v8 = vadd.f32 %v1129_v5, %v1113_v11  ;;  %v1132_v9 = vadd.f32 %v1130_v53, %v1114_v62  ;;  %v1238_v29 = vrot.slane %v1194_v10, %v2361_v43  ;;  %v1223_v55 = vmul.f32 %v1218_v35, %v2714_v16 }
 0x297   : > { %v1293_v17 = vpop.permute.xlu1 %1292  ;;  %v1224_v18 = vmul.f32 %v1222_v58, %v2714_v16  ;;  %v1250_v28 = vrot.slane %v1193_v0, %v2364_v36  ;;  %v1254_v56 = vrot.slane %v1194_v10, %v2364_v36  ;;  %v1239_v3 = vmul.f32 %v1234_v37, %v1229_v19  ;;  %v1277_v10 = vpop.permute.xlu0 %1276 }
 0x298   : > { %v1147_v22 = vadd.f32 %v1145_v27, %v1131_v8  ;;  %v1148_v4 = vadd.f32 %v1146_v49, %v1132_v9  ;;  %v1240_v51 = vmul.f32 %v1238_v29, %v1229_v19  ;;  %v1270_v63 = vrot.slane %v2575_v2, %v2346_v1 }
 0x299   : > { %v1266_v11 = vrot.slane %v2564_v24, %v2346_v1  ;;  %v1255_v5 = vmul.f32 %v1250_v28, %v2762_v47  ;;  %v1256_v53 = vmul.f32 %v1254_v56, %v2762_v47  ;;  %v1286_v0 = vrot.slane %v2575_v2, %v2349_v60 }
 0x29a   : > { %v1163_v32 = vadd.f32 %v1161_v15, %v1147_v22  ;;  %v1164_v59 = vadd.f32 %v1162_v31, %v1148_v4  ;;  %v1282_v49 = vrot.slane %v2564_v24, %v2349_v60  ;;  %v1272_v25 = vmul.f32 %v1270_v63, %v1261_v30 }
 0x29b   : > { %v1271_v34 = vmul.f32 %v1266_v11, %v1261_v30  ;;  %v1302_v12 = vrot.slane %v2575_v2, %v2361_v43  ;;  %v1298_v14 = vrot.slane %v2564_v24, %v2361_v43  ;;  %v1288_v15 = vmul.f32 %v1286_v0, %v1277_v10 }
 0x29c   : > { %v1179_v26 = vadd.f32 %v1177_v45, %v1163_v32  ;;  %v1180_v23 = vadd.f32 %v1178_v52, %v1164_v59  ;;  %v1309_v38 = vpop.permute.xlu1 %1308  ;;  %v1287_v4 = vmul.f32 %v1282_v49, %v1277_v10  ;;  %v1318_v35 = vrot.slane %v2575_v2, %v2364_v36 }
 0x29d   : > { %v1314_v58 = vrot.slane %v2564_v24, %v2364_v36  ;;  %v1303_v30 = vmul.f32 %v1298_v14, %v1293_v17  ;;  %v1304_v32 = vmul.f32 %v1302_v12, %v1293_v17  ;;  %v1324_v2 = vsel %vm2390_vm8, %v2784_v6, %v2772_v48 }
 0x29e   : > { %v1209_v57 = vadd.f32 %v1207_v61, %v1179_v26  ;;  %v1210_v54 = vadd.f32 %v1208_v39, %v1180_v23  ;;  %v1320_v61 = vmul.f32 %v1318_v35, %v1309_v38  ;;  %v1327_v39 = vpop.permute.xlu0 %1326  ;;  %v1323_v24 = vsel %vm2386_vm7, %v2790_v7, %v2768_v33 }
 0x29f   : > { %v1319_v23 = vmul.f32 %v1314_v58, %v1309_v38  ;;  %v1336_v17 = vrot.slane %v1324_v2, %v2346_v1  ;;  %v1332_v38 = vrot.slane %v1323_v24, %v2346_v1  ;;  %v1352_v56 = vrot.slane %v1324_v2, %v2349_v60 }
 0x2a0   : > { %v1225_v50 = vadd.f32 %v1223_v55, %v1209_v57  ;;  %v1226_v20 = vadd.f32 %v1224_v18, %v1210_v54  ;;  %v1368_v33 = vrot.slane %v1324_v2, %v2361_v43 }
 0x2a1   : > { %v1343_v62 = vpop.permute.xlu1 %1342  ;;  %v1338_v55 = vmul.f32 %v1336_v17, %v1327_v39  ;;  %v1337_v18 = vmul.f32 %v1332_v38, %v1327_v39 }
 0x2a2   : > { %v1241_v16 = vadd.f32 %v1239_v3, %v1225_v50  ;;  %v1242_v27 = vadd.f32 %v1240_v51, %v1226_v20  ;;  %v1375_v54 = vpop.permute.xlu0 %1374  ;;  %v1348_v20 = vrot.slane %v1323_v24, %v2349_v60  ;;  %v1354_v6 = vmul.f32 %v1352_v56, %v1343_v62 }
 0x2a4   : > { %v1257_v8 = vadd.f32 %v1255_v5, %v1241_v16  ;;  %v1258_v9 = vadd.f32 %v1256_v53, %v1242_v27  ;;  %v1353_v51 = vmul.f32 %v1348_v20, %v1343_v62  ;;  %v1364_v5 = vrot.slane %v1323_v24, %v2361_v43 }
 0x2a5   : > { %v1384_v16 = vrot.slane %v1324_v2, %v2364_v36  ;;  %v1474_v20 = vrot.slane %v2627_v41, %v2346_v1 }
 0x2a6   : > { %v1273_v47 = vadd.f32 %v1271_v34, %v1257_v8  ;;  %v1274_v22 = vadd.f32 %v1272_v25, %v1258_v9  ;;  %v1359_v31 = vpop.permute.xlu1 %1358  ;;  %v1390_v3 = vpop.permute.xlu0 %1389  ;;  %v1380_v25 = vrot.slane %v1323_v24, %v2364_v36 }
 0x2a7   : > { %v1370_v53 = vmul.f32 %v1368_v33, %v1359_v31  ;;  %v1369_v27 = vmul.f32 %v1364_v5, %v1359_v31 }
 0x2a8   : > { %v1289_v45 = vadd.f32 %v1287_v4, %v1273_v47  ;;  %v1290_v52 = vadd.f32 %v1288_v15, %v1274_v22  ;;  %v1386_v22 = vmul.f32 %v1384_v16, %v1375_v54  ;;  %v1385_v35 = vmul.f32 %v1380_v25, %v1375_v54 }
 0x2a9   : > { %v1510_v16 = vrot.slane %v2679_v13, %v2361_v43 }
 0x2aa   : > { %v1305_v59 = vadd.f32 %v1303_v30, %v1289_v45  ;;  %v1306_v26 = vadd.f32 %v1304_v32, %v1290_v52  ;;  %v1396_v10 = vpop.permute.xlu0 %1395 }
 0x2ab   : > { %v1405_v19 = vpop.permute.xlu1 %1404 }
 0x2ac   : > { %v1321_v37 = vadd.f32 %v1319_v23, %v1305_v59  ;;  %v1322_v29 = vadd.f32 %v1320_v61, %v1306_v26 }
 0x2ae   : > { %v1340_v28 = vadd.f32 %v1338_v55, %v1322_v29  ;;  %v1339_v48 = vadd.f32 %v1337_v18, %v1321_v37  ;;  %v1437_v59 = vpop.permute.xlu0 %1436  ;;  %v1478_v18 = vrot.slane %v2679_v13, %v2346_v1 }
 0x2b0   : > { %v1421_v57 = vpop.permute.xlu1 %1420  ;;  %v1356_v63 = vadd.f32 %v1354_v6, %v1340_v28  ;;  %v1355_v11 = vadd.f32 %v1353_v51, %v1339_v48  ;;  %v1490_v51 = vrot.slane %v2627_v41, %v2349_v60 }
 0x2b2   : > { %v1372_v0 = vadd.f32 %v1370_v53, %v1356_v63  ;;  %v1371_v12 = vadd.f32 %v1369_v27, %v1355_v11  ;;  %v1485_v28 = vpop.permute.xlu0 %1484 }
 0x2b3   : > { %v1495_v27 = vmul.f32 %v1490_v51, %v1485_v28 }
 0x2b4   : > { %v1388_v45 = vadd.f32 %v1386_v22, %v1372_v0  ;;  %v1387_v32 = vadd.f32 %v1385_v35, %v1371_v12  ;;  %v1522_v12 = vrot.slane %v2627_v41, %v2364_v36 }
 0x2b5   : > { %v1453_v50 = vpop.permute.xlu1 %1452 }
 0x2b7   : > { %v1535_v25 = vpop.permute.xlu0 %1534 }
 0x2b9   : > { %v1392_v7 = vpop.permute.xlu1 %1391 }
 0x2ba   : > { %v1393_v8 = vsel %vm279_vm6, %v1390_v3, %v1392_v7  ;;  %v1394_v62 = vsel %vm279_vm6, %v1392_v7, %v1390_v3 }
 0x2bd   : > { %v1398_v49 = vpop.permute.xlu1 %1397 }
 0x2be   : > { %v1399_v9 = vsel %vm286_vm3, %v1396_v10, %v1398_v49  ;;  %v1400_v34 = vsel %vm286_vm3, %v1398_v49, %v1396_v10  ;;  %v1506_v10 = vrot.slane %v2627_v41, %v2361_v43 }
 0x2bf   : > { %v1401_v14 = vsel %vm2341_vm5, %v1399_v9, %v1394_v62  ;;  %v1402_v47 = vsel %vm2337_vm4, %v1400_v34, %v1393_v8  ;;  %v1532_v63 = vsel %vm2390_vm8, %v1393_v8, %v1400_v34  ;;  %v1526_v34 = vrot.slane %v2679_v13, %v2364_v36 }
 0x2c0   : > { %v1410_v4 = vrot.slane %v1401_v14, %v2346_v1  ;;  %v1414_v15 = vrot.slane %v1402_v47, %v2346_v1  ;;  %v1430_v31 = vrot.slane %v1402_v47, %v2349_v60  ;;  %v1426_v21 = vrot.slane %v1401_v14, %v2349_v60 }
 0x2c1   : > { %v1469_v58 = vpop.permute.xlu1 %1468  ;;  %v1446_v44 = vrot.slane %v1402_v47, %v2361_v43  ;;  %v1442_v46 = vrot.slane %v1401_v14, %v2361_v43  ;;  %v1462_v23 = vrot.slane %v1402_v47, %v2364_v36  ;;  %v1458_v37 = vrot.slane %v1401_v14, %v2364_v36 }
 0x2c2   : > { %v1415_v52 = vmul.f32 %v1410_v4, %v1405_v19  ;;  %v1416_v30 = vmul.f32 %v1414_v15, %v1405_v19  ;;  %v1432_v26 = vmul.f32 %v1430_v31, %v1421_v57  ;;  %v1431_v39 = vmul.f32 %v1426_v21, %v1421_v57 }
 0x2c3   : > { %v1448_v24 = vmul.f32 %v1446_v44, %v1437_v59  ;;  %v1447_v54 = vmul.f32 %v1442_v46, %v1437_v59  ;;  %v1464_v55 = vmul.f32 %v1462_v23, %v1453_v50  ;;  %v1463_v56 = vmul.f32 %v1458_v37, %v1453_v50 }
 0x2c4   : > { %v1418_v61 = vadd.f32 %v1416_v30, %v1388_v45  ;;  %v1417_v29 = vadd.f32 %v1415_v52, %v1387_v32  ;;  %v1494_v57 = vrot.slane %v2679_v13, %v2349_v60  ;;  %v1480_v3 = vmul.f32 %v1478_v18, %v1469_v58  ;;  %v1583_v32 = vpop.permute.xlu0 %1582 }
 0x2c5   : > { %v1479_v7 = vmul.f32 %v1474_v20, %v1469_v58  ;;  %v1531_v50 = vsel %vm2386_vm7, %v1394_v62, %v1399_v9  ;;  %v1544_v49 = vrot.slane %v1532_v63, %v2346_v1  ;;  %v1560_v21 = vrot.slane %v1532_v63, %v2349_v60 }
 0x2c6   : > { %v1434_v2 = vadd.f32 %v1432_v26, %v1418_v61  ;;  %v1501_v17 = vpop.permute.xlu1 %1500  ;;  %v1433_v38 = vadd.f32 %v1431_v39, %v1417_v29  ;;  %v1496_v5 = vmul.f32 %v1494_v57, %v1485_v28  ;;  %v1540_v40 = vrot.slane %v1531_v50, %v2346_v1 }
 0x2c7   : > { %v1512_v8 = vmul.f32 %v1510_v16, %v1501_v17  ;;  %v1511_v9 = vmul.f32 %v1506_v10, %v1501_v17  ;;  %v1546_v35 = vmul.f32 %v1544_v49, %v1535_v25  ;;  %v1592_v58 = vrot.slane %v1532_v63, %v2364_v36 }
 0x2c8   : > { %v1450_v19 = vadd.f32 %v1448_v24, %v1434_v2  ;;  %v1449_v48 = vadd.f32 %v1447_v54, %v1433_v38  ;;  %v1545_v45 = vmul.f32 %v1540_v40, %v1535_v25  ;;  %v1556_v1 = vrot.slane %v1531_v50, %v2349_v60 }
 0x2c9   : > { %v1572_v44 = vrot.slane %v1531_v50, %v2361_v43  ;;  %v1576_v41 = vrot.slane %v1532_v63, %v2361_v43  ;;  %v1588_v59 = vrot.slane %v1531_v50, %v2364_v36  ;;  %v1594_v2 = vmul.f32 %v1592_v58, %v1583_v32 }
 0x2ca   : > { %v1466_v6 = vadd.f32 %v1464_v55, %v1450_v19  ;;  %v1465_v33 = vadd.f32 %v1463_v56, %v1449_v48 }
 0x2cb   : > { %v1517_v11 = vpop.permute.xlu1 %1516  ;;  %v1593_v24 = vmul.f32 %v1588_v59, %v1583_v32 }
 0x2cc   : > { %v1482_v53 = vadd.f32 %v1480_v3, %v1466_v6  ;;  %v1481_v0 = vadd.f32 %v1479_v7, %v1465_v33  ;;  %v1528_v47 = vmul.f32 %v1526_v34, %v1517_v11  ;;  %v1527_v15 = vmul.f32 %v1522_v12, %v1517_v11 }
 0x2ce   : > { %v1498_v42 = vadd.f32 %v1496_v5, %v1482_v53  ;;  %v1497_v62 = vadd.f32 %v1495_v27, %v1481_v0 }
 0x2d0   : > { %v1514_v14 = vadd.f32 %v1512_v8, %v1498_v42  ;;  %v1551_v22 = vpop.permute.xlu1 %1550  ;;  %v1513_v4 = vadd.f32 %v1511_v9, %v1497_v62 }
 0x2d1   : > { %v1562_v30 = vmul.f32 %v1560_v21, %v1551_v22  ;;  %v1561_v26 = vmul.f32 %v1556_v1, %v1551_v22 }
 0x2d2   : > { %v1530_v31 = vadd.f32 %v1528_v47, %v1514_v14  ;;  %v1529_v13 = vadd.f32 %v1527_v15, %v1513_v4 }
 0x2d4   : > { %v1548_v52 = vadd.f32 %v1546_v35, %v1530_v31  ;;  %v1547_v46 = vadd.f32 %v1545_v45, %v1529_v13 }
 0x2d5   : > { %v1567_v23 = vpop.permute.xlu1 %1566 }
 0x2d6   : > { %v1564_v61 = vadd.f32 %v1562_v30, %v1548_v52  ;;  %v1577_v39 = vmul.f32 %v1572_v44, %v1567_v23  ;;  %v1578_v37 = vmul.f32 %v1576_v41, %v1567_v23  ;;  %v1563_v29 = vadd.f32 %v1561_v26, %v1547_v46 }
 0x2d8   : > { %v1580_v60 = vadd.f32 %v1578_v37, %v1564_v61  ;;  %v1579_v17 = vadd.f32 %v1577_v39, %v1563_v29 }
 0x2da   : > { %v1596_v54 = vadd.f32 %v1594_v2, %v1580_v60  ;;  %v1601_v38 = vpop.permute.xlu1 %1600  ;;  %v1595_v43 = vadd.f32 %v1593_v24, %v1579_v17 }
 0x2dc   : > { %v1604_v19 = vadd.f32 %v1601_v38, %v1596_v54  ;;  %v1603_v36 = vadd.f32 %v1601_v38, %v1595_v43 }
 0x2de   : > { %v1606_v55 = vmax.f32 %v1604_v19, 0.0  ;;  %v1605_v18 = vmax.f32 %v1603_v36, 0.0 }
 0x2e0   : > { %v1609_v28 = vcombine.low %v1605_v18, %v1606_v55 }
 0x2e2   : > { %1611 = vst [vmem:[%s240_s14] sm:$0xff] %v1609_v28 }
 0x2e3   : > { %1917 = shalt.err (!%p1914_p4)
}
 0x2e4   : > { %s1918_s13 = scalar_lea.hbm %s2912_s26, 128  ;;  %s1922_s11 = scalar_lea.hbm %s2961_s5, 256 }
 0x2e5   : > { %p1919_p5 = scmp.ne.s32.totalorder %s2912_s26, %s1918_s13  ;;  %p1923_p0 = scmp.lt.u32.totalorder %s2912_s26, %s2961_s5 }
 0x2e6   : > { %p1924_p1 = scmp.lt.u32.totalorder %s1922_s11, %s1918_s13  ;;  %p1926_p6 = scmp.lt.u32.totalorder %s1918_s13, %s2912_s26 }
 0x2e7   : > { %p1920_p8 = pnand %p1919_p5, %p3033_p11 }
 0x2e8   : > { %p1925_p3 = por %p1924_p1, %p1923_p0 }
 0x2e9   : > { %p1921_p9 = pneg %p1920_p8 }
 0x2ea   : > { %p1927_p12 = por %p1926_p6, %p1925_p3 }
 0x2ec   : > { %p1928_p13 = pnand %p1927_p12, %p1921_p9 }
 0x2ee   : > { %1931 = shalt.err (!%p1928_p13)
}
 0x2ef   : > { %1715 = dma.vmem_to_hbm [thread:$0]  (%p3033_p11), %s2914_s29, 128, %s2912_s26, %s1613_s28  }
 0x2f0 PF: > { %s1639_s12 = sand.u32 1, %s1958_s18   ;;  %p3034_p7 = scmp.ne.s32.totalorder %s2994_s6, 0 }
 0x2f1   : > { %p3035_p10 = scmp.ge.s32.totalorder %s1970_s21, 2  ;;  %s1640_s14 = scalar_lea.sflag [#allocation4], %s1639_s12 }
 0x2f3   : > { %p1722_p2 = pnand %p3035_p10, %p3034_p7 }
 0x2f5   : > { %1953 = dma.done.wait (!%p1722_p2), %s1640_s14, 128  }
 0x2f6   : > { %1955 = vsyncadd (!%p1722_p2), %s1640_s14, 4294967168  ;;  %p18_p4 = scmp.ge.s32.totalorder %s2069_s24, 4   ;;  %s3036_s18 = smov %s1962_s19 }
 0x2f7   : > { %s3037_s19 = smov %s1966_s20  ;;  %s3038_s20 = smov %s2081_s27 }
 0x2f8   : > { %s3039_s21 = smov %s2069_s24  ;;  %20 = sbr.rel (!%p18_p4) target bundleno = 5 (0x5), region = 85 }
 0x2ff   :  { %1645 = vsyncpa [#allocation3], 1 }
 0x300   :  { %1647 = vsyncpa [#allocation3 + $0x1], 1 }
 0x301   :  { %1648 = vsyncpa [#allocation4], 1 }
 0x302   :  { %1650 = vsyncpa [#allocation4 + $0x1], 1 }

</bundles_post_ra>
